<compile_context>
chip_gen: v7x
topology: tpu7x:2x2x1
jax: 0.10.0
libtpu: 0.0.40
codegen_flags: <defaults>
</compile_context>

<pallas_src>
import functools

import jax
import jax.numpy as jnp
from jax.experimental import pallas as pl
from jax.experimental.pallas import tpu as pltpu

VMEM_LIMIT = 48 * 1024 * 1024        # leave headroom on v7x (64 MiB physical)


def _round_up(x, m):
    return (x + m - 1) // m * m


def _choose_tk(K, max_tk=1536):
    """Pick a K tile: K itself if small, else the largest 128-multiple divisor."""
    if K <= max_tk:
        return K
    for t in range(max_tk, 127, -128):
        if K % t == 0:
            return t
    return K                          # fallback: single (large) K step


# ----------------------------------------------------------------------------
# Pallas kernels
# ----------------------------------------------------------------------------
def _mm_kernel(*refs, relu, has_res, k_steps):
    """K-tiled matmul with f32 accumulator; epilogue fuses bias (+res) (+ReLU)."""
    if has_res:
        a_ref, b_ref, bias_ref, res_ref, o_ref, acc_ref = refs
    else:
        a_ref, b_ref, bias_ref, o_ref, acc_ref = refs

    @pl.when(pl.program_id(1) == 0)
    def _():
        acc_ref[...] = jnp.zeros_like(acc_ref)

    acc_ref[...] += jnp.dot(a_ref[...], b_ref[...],
                            preferred_element_type=jnp.float32)

    @pl.when(pl.program_id(1) == k_steps - 1)
    def _():
        out = acc_ref[...] + bias_ref[...]          # bias (1, N) broadcasts
        if has_res:
            out = out + res_ref[...].astype(jnp.float32)
        if relu:
            out = jnp.maximum(out, 0.0)
        o_ref[...] = out.astype(o_ref.dtype)


def _max_tap_kernel(p_ref, o_ref):
    """Element-wise max over the leading (tap) axis of the block."""
    m = p_ref[0]
    for i in range(1, p_ref.shape[0]):              # static unroll (9 taps)
        m = jnp.maximum(m, p_ref[i])
    o_ref[...] = m


def _gmp_kernel(x_ref, o_ref):
    """Global max pool: running max over spatial tiles (reduction grid axis)."""
    m = jnp.max(x_ref[...], axis=1, keepdims=True)  # (N, 1, C)

    @pl.when(pl.program_id(0) == 0)
    def _():
        o_ref[...] = m

    @pl.when(pl.program_id(0) != 0)
    def _():
        o_ref[...] = jnp.maximum(o_ref[...], m)


# ----------------------------------------------------------------------------
# Pallas wrappers (jit-cached per shape)
# ----------------------------------------------------------------------------
@functools.partial(jax.jit, static_argnames=("relu", "out_dtype"))
def matmul_bias(a, b, bias, res=None, *, relu, out_dtype=jnp.bfloat16):
    """(M,K) @ (K,N) + bias(N,) [+ res(M,N)] -> (M,N), optional fused ReLU.

    bf16 operands on the MXU, f32 accumulation, K-tiled with VMEM scratch.
    """
    M, K = a.shape
    N = b.shape[1]

    TM = min(512, _round_up(M, 8))
    Mp = _round_up(M, TM)
    TK = _choose_tk(K)
    gm = Mp // TM
    gk = K // TK                       # _choose_tk guarantees divisibility

    a = a.astype(jnp.bfloat16)
    b = b.astype(jnp.bfloat16)
    has_res = res is not None
    if has_res:
        res = res.astype(jnp.bfloat16)
    if Mp != M:
        a = jnp.pad(a, ((0, Mp - M), (0, 0)))
        if has_res:
            res = jnp.pad(res, ((0, Mp - M), (0, 0)))
    bias2 = bias.reshape(1, N).astype(jnp.float32)

    in_specs = [
        pl.BlockSpec((TM, TK), lambda i, k: (i, k)),
        pl.BlockSpec((TK, N), lambda i, k: (k, 0)),
        pl.BlockSpec((1, N), lambda i, k: (0, 0)),
    ]
    inputs = [a, b, bias2]
    if has_res:
        in_specs.append(pl.BlockSpec((TM, N), lambda i, k: (i, 0)))
        inputs.append(res)

    out = pl.pallas_call(
        functools.partial(_mm_kernel, relu=relu, has_res=has_res, k_steps=gk),
        out_shape=jax.ShapeDtypeStruct((Mp, N), out_dtype),
        grid=(gm, gk),
        in_specs=in_specs,
        out_specs=pl.BlockSpec((TM, N), lambda i, k: (i, 0)),
        scratch_shapes=[pltpu.VMEM((TM, N), jnp.float32)],
        compiler_params=pltpu.CompilerParams(
            dimension_semantics=("parallel", "arbitrary"),
            vmem_limit_bytes=VMEM_LIMIT,
        ),
    )(*inputs)
    return out[:M] if Mp != M else out


@jax.jit
def max_over_leading(p):
    """p: (T, M, C) -> (M, C) element-wise max over the leading axis (tiled)."""
    T, M, C = p.shape
    TM = min(512, _round_up(M, 8))
    Mp = _round_up(M, TM)
    if Mp != M:
        p = jnp.pad(p, ((0, 0), (0, Mp - M), (0, 0)))
    out = pl.pallas_call(
        _max_tap_kernel,
        out_shape=jax.ShapeDtypeStruct((Mp, C), p.dtype),
        grid=(Mp // TM,),
        in_specs=[pl.BlockSpec((T, TM, C), lambda i: (0, i, 0))],
        out_specs=pl.BlockSpec((TM, C), lambda i: (i, 0)),
        compiler_params=pltpu.CompilerParams(
            dimension_semantics=("parallel",),
            vmem_limit_bytes=VMEM_LIMIT,
        ),
    )(p)
    return out[:M] if Mp != M else out


@jax.jit
def global_max_pool(x):
    """AdaptiveMaxPool2d((1,1)) + flatten, NHWC -> (N, C).  No HBM transpose."""
    N, H, W, C = x.shape
    HW = H * W
    xr = x.reshape(N, HW, C)
    TS = min(256, _round_up(HW, 8))
    HWp = _round_up(HW, TS)
    if HWp != HW:
        xr = jnp.pad(xr, ((0, 0), (0, HWp - HW), (0, 0)),
                     constant_values=-jnp.inf)
    out = pl.pallas_call(
        _gmp_kernel,
        out_shape=jax.ShapeDtypeStruct((N, 1, C), x.dtype),
        grid=(HWp // TS,),
        in_specs=[pl.BlockSpec((N, TS, C), lambda s: (0, s, 0))],
        out_specs=pl.BlockSpec((N, 1, C), lambda s: (0, 0, 0)),
        compiler_params=pltpu.CompilerParams(
            dimension_semantics=("arbitrary",),
            vmem_limit_bytes=VMEM_LIMIT,
        ),
    )(xr)
    return out.reshape(N, C)


# ----------------------------------------------------------------------------
# Conv / pooling built on the Pallas kernels (im2col glue in plain JAX)
# ----------------------------------------------------------------------------
def _im2col(x, kh, kw, stride, pad):
    """x: (N,H,W,C) -> patches (N*Ho*Wo, kh*kw*C); column order (dy, dx, c)."""
    N, H, W, C = x.shape
    xp = jnp.pad(x, ((0, 0), (pad, pad), (pad, pad), (0, 0)))
    Ho = (H + 2 * pad - kh) // stride + 1
    Wo = (W + 2 * pad - kw) // stride + 1
    cols = []
    for dy in range(kh):
        for dx in range(kw):
            cols.append(xp[:, dy:dy + stride * Ho:stride,
                           dx:dx + stride * Wo:stride, :])
    patches = jnp.concatenate(cols, axis=-1)          # (N,Ho,Wo,kh*kw*C)
    return patches.reshape(N * Ho * Wo, kh * kw * C), Ho, Wo


def _fold_bn(w, bn, eps=1e-5):
    scale = bn["gamma"] / jnp.sqrt(bn["var"] + eps)    # (Cout,)
    w_f = w * scale                                    # broadcast on last axis
    bias = bn["beta"] - bn["mean"] * scale
    return w_f, bias


def conv_bn_act(x, w, bn, stride, relu, res=None):
    """Conv (no bias) + folded BN + optional fused residual + ReLU. NHWC/HWIO."""
    kh, kw, cin, cout = w.shape
    wf, bias = _fold_bn(w, bn)
    N, H, W, C = x.shape
    pad = kh // 2
    if kh == 1 and kw == 1:
        xs = x[:, ::stride, ::stride, :]
        Ho, Wo = xs.shape[1], xs.shape[2]
        a = xs.reshape(N * Ho * Wo, cin)
    else:
        a, Ho, Wo = _im2col(x, kh, kw, stride, pad)
    b = wf.reshape(kh * kw * cin, cout)
    res2 = None if res is None else res.reshape(N * Ho * Wo, cout)
    out = matmul_bias(a, b, bias, res2, relu=relu)
    return out.reshape(N, Ho, Wo, cout)


def maxpool_3x3_s2(x):
    """MaxPool2d(kernel_size=3, stride=2, padding=1), NHWC."""
    N, H, W, C = x.shape
    xp = jnp.pad(x, ((0, 0), (1, 1), (1, 1), (0, 0)),
                 constant_values=-jnp.inf)
    Ho = (H + 2 - 3) // 2 + 1
    Wo = (W + 2 - 3) // 2 + 1
    taps = []
    for dy in range(3):
        for dx in range(3):
            taps.append(xp[:, dy:dy + 2 * Ho:2, dx:dx + 2 * Wo:2, :])
    p = jnp.stack(taps, axis=0).reshape(9, N * Ho * Wo, C)
    out = max_over_leading(p)                          # tiled Pallas reduction
    return out.reshape(N, Ho, Wo, C)


# ----------------------------------------------------------------------------
# ResNet-101 parameter construction (deterministic synthetic init)
# ----------------------------------------------------------------------------
def _conv_w(key, kh, kw, cin, cout):
    std = (2.0 / (kh * kw * cin)) ** 0.5
    return jax.random.normal(key, (kh, kw, cin, cout), jnp.float32) * std


def _bn(c, last=False):
    gamma = jnp.full((c,), 0.5, jnp.float32) if last else jnp.ones((c,), jnp.float32)
    return dict(
        gamma=gamma,
        beta=jnp.zeros((c,), jnp.float32),
        mean=jnp.zeros((c,), jnp.float32),
        var=jnp.ones((c,), jnp.float32),
    )


def _make_bottleneck(key, cin, planes, stride, downsample):
    ks = jax.random.split(key, 4)
    p = dict(
        conv1_w=_conv_w(ks[0], 1, 1, cin, planes), bn1=_bn(planes),
        conv2_w=_conv_w(ks[1], 3, 3, planes, planes), bn2=_bn(planes),
        conv3_w=_conv_w(ks[2], 1, 1, planes, planes * 4),
        bn3=_bn(planes * 4, last=True),                # damped residual branch
        stride=stride,
    )
    if downsample:
        p["down_w"] = _conv_w(ks[3], 1, 1, cin, planes * 4)
        p["down_bn"] = _bn(planes * 4)
    return p


def _make_layer(key, cin, planes, blocks, stride):
    out = []
    for i in range(blocks):
        k = jax.random.fold_in(key, i)
        if i == 0:
            out.append(_make_bottleneck(k, cin, planes, stride, True))
        else:
            out.append(_make_bottleneck(k, planes * 4, planes, 1, False))
    return out


def make_resnet101_params(key, num_classes):
    k = jax.random.split(key, 7)
    params = dict(
        conv1_w=_conv_w(k[0], 7, 7, 3, 64), bn1=_bn(64),
        layer1=_make_layer(k[1], 64, 64, 3, 1),
        layer2=_make_layer(k[2], 256, 128, 4, 2),
        layer3=_make_layer(k[3], 512, 256, 23, 2),
        layer4=_make_layer(k[4], 1024, 512, 3, 2),
        fc_w=jax.random.normal(k[5], (2048, num_classes), jnp.float32)
        * (1.0 / 2048.0) ** 0.5,
        fc_b=jnp.zeros((num_classes,), jnp.float32),
    )
    return params


# ----------------------------------------------------------------------------
# Forward pass
# ----------------------------------------------------------------------------
def _bottleneck_forward(x, p):
    if "down_w" in p:
        ident = conv_bn_act(x, p["down_w"], p["down_bn"], p["stride"],
                            relu=False)
    else:
        ident = x
    out = conv_bn_act(x, p["conv1_w"], p["bn1"], 1, relu=True)
    out = conv_bn_act(out, p["conv2_w"], p["bn2"], p["stride"], relu=True)
    # residual add + ReLU fused into the conv3 matmul epilogue
    out = conv_bn_act(out, p["conv3_w"], p["bn3"], 1, relu=True, res=ident)
    return out


def resnet101_forward(params, x_nchw, num_classes):
    # NCHW (PyTorch convention) -> NHWC internal layout, bf16 activations
    x = jnp.transpose(x_nchw, (0, 2, 3, 1)).astype(jnp.bfloat16)
    x = conv_bn_act(x, params["conv1_w"], params["bn1"], 2, relu=True)
    x = maxpool_3x3_s2(x)
    for layer_name in ("layer1", "layer2", "layer3", "layer4"):
        for blk in params[layer_name]:
            x = _bottleneck_forward(x, blk)
    fea = global_max_pool(x)                            # (N, 2048)

    # Lane-dense classifier: pad Cout to a 128 multiple, slice afterwards.
    ncp = _round_up(num_classes, 128)
    fc_w = jnp.pad(params["fc_w"], ((0, 0), (0, ncp - num_classes)))
    fc_b = jnp.pad(params["fc_b"], ((0, ncp - num_classes),))
    logits = matmul_bias(fea, fc_w, fc_b, relu=False, out_dtype=jnp.float32)
    return logits[:, :num_classes]                      # (N, num_classes)


# ----------------------------------------------------------------------------
if __name__ == "__main__":
    num_classes = 10
    key = jax.random.PRNGKey(0)
    # Small input consistent with an ImageNet-style model: batch=2, 3x64x64.
    x = jax.random.normal(key, (2, 3, 64, 64), jnp.float32)

    params = make_resnet101_params(jax.random.PRNGKey(42), num_classes)

    out = resnet101_forward(params, x, num_classes)
    out = jax.block_until_ready(out)

    assert out.shape == (2, num_classes), out.shape
    assert bool(jnp.all(jnp.isfinite(out)))
    print("KERNEL_OK")
</pallas_src>

<mosaic_0001>
module attributes {stable_mosaic.version = 11 : i64} {
  func.func @_mm_kernel(%arg0: i32, %arg1: i32, %arg2: memref<512x147xbf16, #tpu.memory_space<vmem>>, %arg3: memref<147x64xbf16, #tpu.memory_space<vmem>>, %arg4: memref<1x64xf32, #tpu.memory_space<vmem>>, %arg5: memref<512x64xbf16, #tpu.memory_space<vmem>>, %arg6: memref<512x64xf32, #tpu.memory_space<vmem>>) attributes {dimension_semantics = [#tpu.dimension_semantics<parallel>, #tpu.dimension_semantics<arbitrary>], iteration_bounds = array<i64: 4, 1>, scalar_prefetch = 0 : i64, scratch_operands = 1 : i64, tpu.core_type = #tpu.core_type<tc>, window_params = [{transform_indices = @transform_0, window_bounds = array<i64: 512, 147>}, {transform_indices = @transform_1, window_bounds = array<i64: 147, 64>}, {pipeline_mode = #tpu.pipeline_mode<synchronous>, transform_indices = @transform_2, window_bounds = array<i64: 1, 64>}, {transform_indices = @transform_3, window_bounds = array<i64: 512, 64>}]} {
    %c0_i32 = arith.constant 0 : i32
    %0 = arith.cmpi eq, %arg1, %c0_i32 : i32
    %1 = arith.extui %0 : i1 to i32
    %c0_i32_0 = arith.constant 0 : i32
    %2 = arith.cmpi ne, %1, %c0_i32_0 : i32
    scf.if %2 {
      %cst_10 = arith.constant 0.000000e+00 : f32
      %12 = vector.broadcast %cst_10 : f32 to vector<512x64xf32>
      %c0_11 = arith.constant 0 : index
      %c0_12 = arith.constant 0 : index
      %13 = vector.load %arg6[%c0_11, %c0_12] : memref<512x64xf32, #tpu.memory_space<vmem>>, vector<512x64xf32>
      tpu.vector_store %arg6[%c0_11, %c0_12], %12 {strides = array<i32>} : memref<512x64xf32, #tpu.memory_space<vmem>>, vector<512x64xf32>,
    } else {
    }
    %c0 = arith.constant 0 : index
    %c0_1 = arith.constant 0 : index
    %3 = vector.load %arg6[%c0, %c0_1] : memref<512x64xf32, #tpu.memory_space<vmem>>, vector<512x64xf32>
    %c0_2 = arith.constant 0 : index
    %c0_3 = arith.constant 0 : index
    %4 = vector.load %arg2[%c0_2, %c0_3] : memref<512x147xbf16, #tpu.memory_space<vmem>>, vector<512x147xbf16>
    %c0_4 = arith.constant 0 : index
    %c0_5 = arith.constant 0 : index
    %5 = vector.load %arg3[%c0_4, %c0_5] : memref<147x64xbf16, #tpu.memory_space<vmem>>, vector<147x64xbf16>
    %cst = arith.constant dense<0.000000e+00> : vector<512x64xf32>
    %6 = tpu.matmul %4, %5, %cst {dimension_numbers = #tpu.dot_dimension_numbers<[1], [0], [0], [1], [0, 0, 1, 1], [], []>} : vector<512x147xbf16>, vector<147x64xbf16>, vector<512x64xf32> -> vector<512x64xf32>
    %7 = arith.addf %3, %6 : vector<512x64xf32>
    %c0_6 = arith.constant 0 : index
    %c0_7 = arith.constant 0 : index
    %8 = vector.load %arg6[%c0_6, %c0_7] : memref<512x64xf32, #tpu.memory_space<vmem>>, vector<512x64xf32>
    tpu.vector_store %arg6[%c0_6, %c0_7], %7 {strides = array<i32>} : memref<512x64xf32, #tpu.memory_space<vmem>>, vector<512x64xf32>,
    %c0_i32_8 = arith.constant 0 : i32
    %9 = arith.cmpi eq, %arg1, %c0_i32_8 : i32
    %10 = arith.extui %9 : i1 to i32
    %c0_i32_9 = arith.constant 0 : i32
    %11 = arith.cmpi ne, %10, %c0_i32_9 : i32
    scf.if %11 {
      %c0_10 = arith.constant 0 : index
      %c0_11 = arith.constant 0 : index
      %12 = vector.load %arg6[%c0_10, %c0_11] : memref<512x64xf32, #tpu.memory_space<vmem>>, vector<512x64xf32>
      %c0_12 = arith.constant 0 : index
      %c0_13 = arith.constant 0 : index
      %13 = vector.load %arg4[%c0_12, %c0_13] : memref<1x64xf32, #tpu.memory_space<vmem>>, vector<1x64xf32>
      %14 = vector.broadcast %13 : vector<1x64xf32> to vector<512x64xf32>
      %15 = arith.addf %12, %14 : vector<512x64xf32>
      %cst_14 = arith.constant 0.000000e+00 : f32
      %16 = vector.broadcast %cst_14 : f32 to vector<512x64xf32>
      %17 = arith.maximumf %15, %16 : vector<512x64xf32>
      %18 = arith.truncf %17 : vector<512x64xf32> to vector<512x64xbf16>
      %c0_15 = arith.constant 0 : index
      %c0_16 = arith.constant 0 : index
      %19 = vector.load %arg5[%c0_15, %c0_16] : memref<512x64xbf16, #tpu.memory_space<vmem>>, vector<512x64xbf16>
      tpu.vector_store %arg5[%c0_15, %c0_16], %18 {strides = array<i32>} : memref<512x64xbf16, #tpu.memory_space<vmem>>, vector<512x64xbf16>,
    } else {
    }
    return
  }
  func.func @transform_0(%arg0: i32, %arg1: i32) -> (i32, i32) {
    %c0_i32 = arith.constant 0 : i32
    return %arg0, %arg1 : i32, i32
  }
  func.func @transform_1(%arg0: i32, %arg1: i32) -> (i32, i32) {
    %c0_i32 = arith.constant 0 : i32
    %c0_i32_0 = arith.constant 0 : i32
    return %arg1, %c0_i32 : i32, i32
  }
  func.func @transform_2(%arg0: i32, %arg1: i32) -> (i32, i32) {
    %c0_i32 = arith.constant 0 : i32
    %c0_i32_0 = arith.constant 0 : i32
    %c0_i32_1 = arith.constant 0 : i32
    return %c0_i32, %c0_i32_0 : i32, i32
  }
  func.func @transform_3(%arg0: i32, %arg1: i32) -> (i32, i32) {
    %c0_i32 = arith.constant 0 : i32
    %c0_i32_0 = arith.constant 0 : i32
    return %arg0, %c0_i32 : i32, i32
  }
}

</mosaic_0001>

<bundles_post_ra>
// kernel: matmul_bias.1
= control target key start
LH: loop header
LB: loop body
LE: loop exit
PB: predicated region body
PF: predicated region fallthrough
CT: control target
= control target key end

     0   :  { %s2370_s12 = smov 0   ;;  %s2372_s13 = smov 0   ;;  %s2955_s0 = inlined_call_operand.vmem [shape: bf16[2048,147], index: 0, kind: input, shape index: {}]   ;;  %s2956_s1 = inlined_call_operand.vmem [shape: bf16[147,64], index: 1, kind: input, shape index: {}]   ;;  %s2957_s2 = inlined_call_operand.vmem [shape: f32[1,64], index: 2, kind: input, shape index: {}]   ;;  %s2958_s3 = inlined_call_operand.vmem [shape: bf16[2048,64], index: 3, kind: output, shape index: {}]  }
   0x1   :  { %s2374_s14 = smov 0  }
   0x2 LB: > { %s25_s15 = sadd.s32 1, %s2341_s13  ;;  %p1925_p0 = scmp.ge.s32.totalorder %s2345_s14, 1  ;;  %s2345_s14 = sphi %s2374_s14, %s13_s14   ;;  %s2341_s13 = sphi %s2372_s13, %s2960_s13   ;;  %s2337_s12 = sphi %s2370_s12, %s2959_s12  }
   0x3   : > { %p27_p1 = scmp.ge.s32.totalorder %s25_s15, 4  ;;  %p169_p2 = scmp.lt.s32.totalorder %s2345_s14, 5 }
   0x5   : > { %s2962_s15 = smov (%p27_p1, %s25_s15), 0  ;;  %p170_p3 = pnand %p1925_p0, %p169_p2 }
   0x6   : > { %v2216_v0 = vld [vmem:[%s2956_s1] sm:$0xff] (!%p170_p3)   ;;  %v2347_v1 = vmov (!%p170_p3), 0   ;;  %v2217_v2 = vld [vmem:[%s2956_s1 + $0x8] sm:$0xff] (!%p170_p3)   ;;  %v2218_v3 = vld [vmem:[%s2956_s1 + $0x10] sm:$0xff] (!%p170_p3)   ;;  %s1926_s22 = sshll.u32 (!%p170_p3), %s2337_s12, 6  ;;  %vm789_vm0 = vcmask (!%p170_p3), 154624  }
   0x7   : > { %173 = sbr.rel (%p170_p3) target bundleno = 401 (0x191), region = 32  ;;  %893 = vmatprep.subr.bf16.mxu0 (!%p170_p3), %v2347_v1  ;;  %2169 = vmatprep.subr.bf16.mxu1 (!%p170_p3), %v2347_v1  ;;  %p205_p4 = scmp.lt.s32.totalorder (!%p170_p3), %s1926_s22, 255  ;;  %v2219_v4 = vld [vmem:[%s2956_s1 + $0x18] sm:$0xff] (!%p170_p3)   ;;  %v2220_v5 = vld [vmem:[%s2956_s1 + $0x20] sm:$0xff] (!%p170_p3)   ;;  %v2221_v8 = vld [vmem:[%s2956_s1 + $0x28] sm:$0xff] (!%p170_p3)   ;;  %vm886_vm1 = vcmask (!%p170_p3), 1040384  }
   0x8   : > { %894 = vmatpush1.bf16.msra.mxu0 (!%p170_p3), %v2216_v0  ;;  %2179 = vmatpush1.bf16.msra.mxu1 (!%p170_p3), %v2216_v0  ;;  %v2222_v9 = vld [vmem:[%s2956_s1 + $0x30] sm:$0xff] (!%p170_p3)   ;;  %v2223_v10 = vld [vmem:[%s2956_s1 + $0x38] sm:$0xff] (!%p170_p3)   ;;  %vm887_vm2 = vcmask (!%p170_p3), 1041408   ;;  %v2348_v11 = vmov (!%p170_p3), 65535   ;;  %v2224_v13 = vld [vmem:[%s2956_s1 + $0x40] sm:$0xff] (!%p170_p3)   ;;  %vm232_vm3 = vcmask (!%p170_p3), 523264  }
   0x9   : > { %895 = vmatprep.subr.bf16.mxu0 (!%p170_p3), %v2347_v1  ;;  %2170 = vmatprep.subr.bf16.mxu1 (!%p170_p3), %v2347_v1  ;;  %v888_v12 = vsel (!%p170_p3), %vm886_vm1, 4294967295, %v2348_v11  ;;  %v2225_v14 = vld [vmem:[%s2956_s1 + $0x48] ss:$0 sps:$4 sm:$0x33] (!%p170_p3)   ;;  %v2349_v17 = vmov (!%p170_p3), 0.0   ;;  %vm1769_vm4 = vcmask (!%p170_p3), 519168  }
   0xa   : > { %v889_v15 = vsel (!%p170_p3), %vm887_vm2, %v888_v12, 0  ;;  %233 = vst.msk [vmem:[#allocation2] sm:$0xff] (!%p170_p3), %vm232_vm3, %v2349_v17  ;;  %234 = vst.msk [vmem:[#allocation2 + $0x8] sm:$0xff] (!%p170_p3), %vm232_vm3, %v2349_v17 }
   0xb   : > { %v2448_v16 = vand.u32 (!%p170_p3), %v2225_v14, %v889_v15  ;;  %235 = vst.msk [vmem:[#allocation2 + $0x10] sm:$0xff] (!%p170_p3), %vm232_vm3, %v2349_v17  ;;  %236 = vst.msk [vmem:[#allocation2 + $0x18] sm:$0xff] (!%p170_p3), %vm232_vm3, %v2349_v17 }
   0xc   : > { %896 = vmatpush1.bf16.msra.mxu0 (!%p170_p3), %v2217_v2  ;;  %2180 = vmatpush1.bf16.msra.mxu1 (!%p170_p3), %v2217_v2  ;;  %237 = vst.msk [vmem:[#allocation2 + $0x20] sm:$0xff] (!%p170_p3), %vm232_vm3, %v2349_v17  ;;  %238 = vst.msk [vmem:[#allocation2 + $0x28] sm:$0xff] (!%p170_p3), %vm232_vm3, %v2349_v17 }
   0xd   : > { %897 = vmatprep.subr.bf16.mxu0 (!%p170_p3), %v2347_v1  ;;  %2171 = vmatprep.subr.bf16.mxu1 (!%p170_p3), %v2347_v1  ;;  %239 = vst.msk [vmem:[#allocation2 + $0x30] sm:$0xff] (!%p170_p3), %vm232_vm3, %v2349_v17  ;;  %240 = vst.msk [vmem:[#allocation2 + $0x38] sm:$0xff] (!%p170_p3), %vm232_vm3, %v2349_v17 }
   0xe   : > { %s2964_s22 = smov (!%p205_p4, %s1926_s22), 255  ;;  %241 = vst.msk [vmem:[#allocation2 + $0x40] sm:$0xff] %vm232_vm3, %v2349_v17  ;;  %242 = vst.msk [vmem:[#allocation2 + $0x48] sm:$0xff] %vm232_vm3, %v2349_v17 }
   0xf   : > { %s2104_s25 = sshll.u32 %s2964_s22, 3  ;;  %243 = vst.msk [vmem:[#allocation2 + $0x50] sm:$0xff] %vm232_vm3, %v2349_v17  ;;  %244 = vst.msk [vmem:[#allocation2 + $0x58] sm:$0xff] %vm232_vm3, %v2349_v17  ;;  %s1930_s19 = sshll.u32 %s2964_s22, 2 }
  0x10   : > { %898 = vmatpush1.bf16.msra.mxu0 %v2218_v3  ;;  %2181 = vmatpush1.bf16.msra.mxu1 %v2218_v3  ;;  %s2414_s28 = scalar_lea.vmem %s2955_s0, %s2104_s25  ;;  %245 = vst.msk [vmem:[#allocation2 + $0x60] sm:$0xff] %vm232_vm3, %v2349_v17  ;;  %246 = vst.msk [vmem:[#allocation2 + $0x68] sm:$0xff] %vm232_vm3, %v2349_v17  ;;  %s2695_s22 = scalar_lea.vmem %s2958_s3, %s1930_s19 }
  0x11   : > { %899 = vmatprep.subr.bf16.mxu0 %v2347_v1  ;;  %2172 = vmatprep.subr.bf16.mxu1 %v2347_v1  ;;  %v2228_v6 = vld [vmem:[%s2414_s28 + $0x4] ss:$8 sps:$4 sm:$0xff]   ;;  %247 = vst.msk [vmem:[#allocation2 + $0x70] sm:$0xff] %vm232_vm3, %v2349_v17  ;;  %248 = vst.msk [vmem:[#allocation2 + $0x78] sm:$0xff] %vm232_vm3, %v2349_v17  ;;  %v2226_v18 = vld [vmem:[%s2414_s28] ss:$8 sps:$4 sm:$0xff]  }
  0x12   : > { %v2231_v7 = vld [vmem:[%s2414_s28 + $0x104] ss:$8 sps:$4 sm:$0xff]   ;;  %2005 = vmatprep.mubr.msk.bf16.mxu0 %vm789_vm0, %v2228_v6  ;;  %249 = vst.msk [vmem:[#allocation2 + $0x80] sm:$0xff] %vm232_vm3, %v2349_v17  ;;  %250 = vst.msk [vmem:[#allocation2 + $0x88] sm:$0xff] %vm232_vm3, %v2349_v17  ;;  %v2229_v19 = vld [vmem:[%s2414_s28 + $0x100] ss:$8 sps:$4 sm:$0xff]  }
  0x13   : > { %2021 = vmatprep.mubr.msk.bf16.mxu1 %vm789_vm0, %v2231_v7  ;;  %251 = vst.msk [vmem:[#allocation2 + $0x90] sm:$0xff] %vm232_vm3, %v2349_v17  ;;  %252 = vst.msk [vmem:[#allocation2 + $0x98] sm:$0xff] %vm232_vm3, %v2349_v17  ;;  %v2232_v20 = vld [vmem:[%s2414_s28 + $0x14] ss:$8 sps:$4 sm:$0xff]   ;;  %v2236_v22 = vld [vmem:[%s2414_s28 + $0x10] ss:$8 sps:$4 sm:$0xff]  }
  0x14   : > { %900 = vmatpush1.bf16.msra.mxu0 %v2219_v4  ;;  %2182 = vmatpush1.bf16.msra.mxu1 %v2219_v4  ;;  %253 = vst.msk [vmem:[#allocation2 + $0xa0] sm:$0xff] %vm232_vm3, %v2349_v17  ;;  %254 = vst.msk [vmem:[#allocation2 + $0xa8] sm:$0xff] %vm232_vm3, %v2349_v17  ;;  %v2234_v21 = vld [vmem:[%s2414_s28 + $0x114] ss:$8 sps:$4 sm:$0xff]   ;;  %v2237_v23 = vld [vmem:[%s2414_s28 + $0x110] ss:$8 sps:$4 sm:$0xff]  }
  0x15   : > { %901 = vmatprep.subr.bf16.mxu0 %v2347_v1  ;;  %2173 = vmatprep.subr.bf16.mxu1 %v2347_v1  ;;  %255 = vst.msk [vmem:[#allocation2 + $0xb0] sm:$0xff] %vm232_vm3, %v2349_v17  ;;  %256 = vst.msk [vmem:[#allocation2 + $0xb8] sm:$0xff] %vm232_vm3, %v2349_v17  ;;  %v2238_v24 = vld [vmem:[%s2414_s28 + $0x24] ss:$8 sps:$4 sm:$0xff]   ;;  %v2242_v26 = vld [vmem:[%s2414_s28 + $0x20] ss:$8 sps:$4 sm:$0xff]  }
  0x16   : > { %257 = vst.msk [vmem:[#allocation2 + $0xc0] sm:$0xff] %vm232_vm3, %v2349_v17  ;;  %258 = vst.msk [vmem:[#allocation2 + $0xc8] sm:$0xff] %vm232_vm3, %v2349_v17  ;;  %v2240_v25 = vld [vmem:[%s2414_s28 + $0x124] ss:$8 sps:$4 sm:$0xff]   ;;  %v2243_v27 = vld [vmem:[%s2414_s28 + $0x120] ss:$8 sps:$4 sm:$0xff]  }
  0x17   : > { %259 = vst.msk [vmem:[#allocation2 + $0xd0] sm:$0xff] %vm232_vm3, %v2349_v17  ;;  %260 = vst.msk [vmem:[#allocation2 + $0xd8] sm:$0xff] %vm232_vm3, %v2349_v17  ;;  %v2244_v28 = vld [vmem:[%s2414_s28 + $0x34] ss:$8 sps:$4 sm:$0xff]   ;;  %v2248_v30 = vld [vmem:[%s2414_s28 + $0x30] ss:$8 sps:$4 sm:$0xff]  }
  0x18   : > { %902 = vmatpush1.bf16.msra.mxu0 %v2220_v5  ;;  %2183 = vmatpush1.bf16.msra.mxu1 %v2220_v5  ;;  %261 = vst.msk [vmem:[#allocation2 + $0xe0] sm:$0xff] %vm232_vm3, %v2349_v17  ;;  %262 = vst.msk [vmem:[#allocation2 + $0xe8] sm:$0xff] %vm232_vm3, %v2349_v17  ;;  %v2246_v29 = vld [vmem:[%s2414_s28 + $0x134] ss:$8 sps:$4 sm:$0xff]   ;;  %v2249_v31 = vld [vmem:[%s2414_s28 + $0x130] ss:$8 sps:$4 sm:$0xff]  }
  0x19   : > { %903 = vmatprep.subr.bf16.mxu0 %v2347_v1  ;;  %2174 = vmatprep.subr.bf16.mxu1 %v2347_v1  ;;  %263 = vst.msk [vmem:[#allocation2 + $0xf0] sm:$0xff] %vm232_vm3, %v2349_v17  ;;  %264 = vst.msk [vmem:[#allocation2 + $0xf8] sm:$0xff] %vm232_vm3, %v2349_v17  ;;  %v2250_v32 = vld [vmem:[%s2414_s28 + $0x44] ss:$8 sps:$4 sm:$0xff]   ;;  %v2254_v34 = vld [vmem:[%s2414_s28 + $0x40] ss:$8 sps:$4 sm:$0xff]  }
  0x1a   : > { %265 = vst.msk [vmem:[#allocation2 + $0x100] sm:$0xff] %vm232_vm3, %v2349_v17  ;;  %266 = vst.msk [vmem:[#allocation2 + $0x108] sm:$0xff] %vm232_vm3, %v2349_v17  ;;  %v2252_v33 = vld [vmem:[%s2414_s28 + $0x144] ss:$8 sps:$4 sm:$0xff]   ;;  %v2255_v35 = vld [vmem:[%s2414_s28 + $0x140] ss:$8 sps:$4 sm:$0xff]  }
  0x1b   : > { %267 = vst.msk [vmem:[#allocation2 + $0x110] sm:$0xff] %vm232_vm3, %v2349_v17  ;;  %268 = vst.msk [vmem:[#allocation2 + $0x118] sm:$0xff] %vm232_vm3, %v2349_v17  ;;  %v2256_v36 = vld [vmem:[%s2414_s28 + $0x54] ss:$8 sps:$4 sm:$0xff]   ;;  %v2260_v38 = vld [vmem:[%s2414_s28 + $0x50] ss:$8 sps:$4 sm:$0xff]  }
  0x1c   : > { %904 = vmatpush1.bf16.msra.mxu0 %v2221_v8  ;;  %2184 = vmatpush1.bf16.msra.mxu1 %v2221_v8  ;;  %269 = vst.msk [vmem:[#allocation2 + $0x120] sm:$0xff] %vm232_vm3, %v2349_v17  ;;  %270 = vst.msk [vmem:[#allocation2 + $0x128] sm:$0xff] %vm232_vm3, %v2349_v17  ;;  %v2258_v37 = vld [vmem:[%s2414_s28 + $0x154] ss:$8 sps:$4 sm:$0xff]   ;;  %v2261_v39 = vld [vmem:[%s2414_s28 + $0x150] ss:$8 sps:$4 sm:$0xff]  }
  0x1d   : > { %905 = vmatprep.subr.bf16.mxu0 %v2347_v1  ;;  %2175 = vmatprep.subr.bf16.mxu1 %v2347_v1  ;;  %271 = vst.msk [vmem:[#allocation2 + $0x130] sm:$0xff] %vm232_vm3, %v2349_v17  ;;  %272 = vst.msk [vmem:[#allocation2 + $0x138] sm:$0xff] %vm232_vm3, %v2349_v17  ;;  %v2262_v40 = vld [vmem:[%s2414_s28 + $0x64] ss:$8 sps:$4 sm:$0xff]   ;;  %v2266_v42 = vld [vmem:[%s2414_s28 + $0x60] ss:$8 sps:$4 sm:$0xff]  }
  0x1e   : > { %273 = vst.msk [vmem:[#allocation2 + $0x140] sm:$0xff] %vm232_vm3, %v2349_v17  ;;  %274 = vst.msk [vmem:[#allocation2 + $0x148] sm:$0xff] %vm232_vm3, %v2349_v17  ;;  %v2264_v41 = vld [vmem:[%s2414_s28 + $0x164] ss:$8 sps:$4 sm:$0xff]   ;;  %v2267_v43 = vld [vmem:[%s2414_s28 + $0x160] ss:$8 sps:$4 sm:$0xff]  }
  0x1f   : > { %275 = vst.msk [vmem:[#allocation2 + $0x150] sm:$0xff] %vm232_vm3, %v2349_v17  ;;  %276 = vst.msk [vmem:[#allocation2 + $0x158] sm:$0xff] %vm232_vm3, %v2349_v17  ;;  %v2268_v44 = vld [vmem:[%s2414_s28 + $0x74] ss:$8 sps:$4 sm:$0xff]   ;;  %v2272_v46 = vld [vmem:[%s2414_s28 + $0x70] ss:$8 sps:$4 sm:$0xff]  }
  0x20   : > { %906 = vmatpush1.bf16.msra.mxu0 %v2222_v9  ;;  %2185 = vmatpush1.bf16.msra.mxu1 %v2222_v9  ;;  %277 = vst.msk [vmem:[#allocation2 + $0x160] sm:$0xff] %vm232_vm3, %v2349_v17  ;;  %278 = vst.msk [vmem:[#allocation2 + $0x168] sm:$0xff] %vm232_vm3, %v2349_v17  ;;  %v2270_v45 = vld [vmem:[%s2414_s28 + $0x174] ss:$8 sps:$4 sm:$0xff]   ;;  %v2273_v47 = vld [vmem:[%s2414_s28 + $0x170] ss:$8 sps:$4 sm:$0xff]  }
  0x21   : > { %907 = vmatprep.subr.bf16.mxu0 %v2347_v1  ;;  %2176 = vmatprep.subr.bf16.mxu1 %v2347_v1  ;;  %279 = vst.msk [vmem:[#allocation2 + $0x170] sm:$0xff] %vm232_vm3, %v2349_v17  ;;  %280 = vst.msk [vmem:[#allocation2 + $0x178] sm:$0xff] %vm232_vm3, %v2349_v17  ;;  %v2274_v48 = vld [vmem:[%s2414_s28 + $0x84] ss:$8 sps:$4 sm:$0xff]   ;;  %v2278_v50 = vld [vmem:[%s2414_s28 + $0x80] ss:$8 sps:$4 sm:$0xff]  }
  0x22   : > { %281 = vst.msk [vmem:[#allocation2 + $0x180] sm:$0xff] %vm232_vm3, %v2349_v17  ;;  %282 = vst.msk [vmem:[#allocation2 + $0x188] sm:$0xff] %vm232_vm3, %v2349_v17  ;;  %v2276_v49 = vld [vmem:[%s2414_s28 + $0x184] ss:$8 sps:$4 sm:$0xff]   ;;  %v2279_v51 = vld [vmem:[%s2414_s28 + $0x180] ss:$8 sps:$4 sm:$0xff]  }
  0x23   : > { %283 = vst.msk [vmem:[#allocation2 + $0x190] sm:$0xff] %vm232_vm3, %v2349_v17  ;;  %284 = vst.msk [vmem:[#allocation2 + $0x198] sm:$0xff] %vm232_vm3, %v2349_v17  ;;  %v2280_v52 = vld [vmem:[%s2414_s28 + $0x94] ss:$8 sps:$4 sm:$0xff]   ;;  %v2284_v54 = vld [vmem:[%s2414_s28 + $0x90] ss:$8 sps:$4 sm:$0xff]  }
  0x24   : > { %908 = vmatpush1.bf16.msra.mxu0 %v2223_v10  ;;  %2186 = vmatpush1.bf16.msra.mxu1 %v2223_v10  ;;  %285 = vst.msk [vmem:[#allocation2 + $0x1a0] sm:$0xff] %vm232_vm3, %v2349_v17  ;;  %286 = vst.msk [vmem:[#allocation2 + $0x1a8] sm:$0xff] %vm232_vm3, %v2349_v17  ;;  %v2282_v53 = vld [vmem:[%s2414_s28 + $0x194] ss:$8 sps:$4 sm:$0xff]   ;;  %v2285_v55 = vld [vmem:[%s2414_s28 + $0x190] ss:$8 sps:$4 sm:$0xff]  }
  0x25   : > { %909 = vmatprep.subr.bf16.mxu0 %v2347_v1  ;;  %2177 = vmatprep.subr.bf16.mxu1 %v2347_v1  ;;  %287 = vst.msk [vmem:[#allocation2 + $0x1b0] sm:$0xff] %vm232_vm3, %v2349_v17  ;;  %288 = vst.msk [vmem:[#allocation2 + $0x1b8] sm:$0xff] %vm232_vm3, %v2349_v17  ;;  %v2286_v56 = vld [vmem:[%s2414_s28 + $0xa4] ss:$8 sps:$4 sm:$0xff]   ;;  %v2290_v58 = vld [vmem:[%s2414_s28 + $0xa0] ss:$8 sps:$4 sm:$0xff]  }
  0x26   : > { %289 = vst.msk [vmem:[#allocation2 + $0x1c0] sm:$0xff] %vm232_vm3, %v2349_v17  ;;  %290 = vst.msk [vmem:[#allocation2 + $0x1c8] sm:$0xff] %vm232_vm3, %v2349_v17  ;;  %v2288_v57 = vld [vmem:[%s2414_s28 + $0x1a4] ss:$8 sps:$4 sm:$0xff]   ;;  %v2291_v59 = vld [vmem:[%s2414_s28 + $0x1a0] ss:$8 sps:$4 sm:$0xff]  }
  0x27   : > { %291 = vst.msk [vmem:[#allocation2 + $0x1d0] sm:$0xff] %vm232_vm3, %v2349_v17  ;;  %292 = vst.msk [vmem:[#allocation2 + $0x1d8] sm:$0xff] %vm232_vm3, %v2349_v17  ;;  %v2292_v60 = vld [vmem:[%s2414_s28 + $0xb4] ss:$8 sps:$4 sm:$0xff]   ;;  %v2296_v62 = vld [vmem:[%s2414_s28 + $0xb0] ss:$8 sps:$4 sm:$0xff]  }
  0x28   : > { %910 = vmatpush1.bf16.msra.mxu0 %v2224_v13  ;;  %2187 = vmatpush1.bf16.msra.mxu1 %v2224_v13  ;;  %293 = vst.msk [vmem:[#allocation2 + $0x1e0] sm:$0xff] %vm232_vm3, %v2349_v17  ;;  %294 = vst.msk [vmem:[#allocation2 + $0x1e8] sm:$0xff] %vm232_vm3, %v2349_v17  ;;  %v2294_v61 = vld [vmem:[%s2414_s28 + $0x1b4] ss:$8 sps:$4 sm:$0xff]   ;;  %v2297_v63 = vld [vmem:[%s2414_s28 + $0x1b0] ss:$8 sps:$4 sm:$0xff]  }
  0x29   : > { %911 = vmatprep.subr.bf16.mxu0 %v2347_v1  ;;  %2178 = vmatprep.subr.bf16.mxu1 %v2347_v1  ;;  %295 = vst.msk [vmem:[#allocation2 + $0x1f0] sm:$0xff] %vm232_vm3, %v2349_v17  ;;  %296 = vst.msk [vmem:[#allocation2 + $0x1f8] sm:$0xff] %vm232_vm3, %v2349_v17  ;;  %v2298_v0 = vld [vmem:[%s2414_s28 + $0xc4] ss:$8 sps:$4 sm:$0xff]   ;;  %v2302_v2 = vld [vmem:[%s2414_s28 + $0xc0] ss:$8 sps:$4 sm:$0xff]  }
  0x2a   : > { %v2300_v1 = vld [vmem:[%s2414_s28 + $0x1c4] ss:$8 sps:$4 sm:$0xff]   ;;  %v2303_v3 = vld [vmem:[%s2414_s28 + $0x1c0] ss:$8 sps:$4 sm:$0xff]   ;;  %v2304_v4 = vld [vmem:[%s2414_s28 + $0xd4] ss:$8 sps:$4 sm:$0xff]  }
  0x2b   : > { %v2306_v5 = vld [vmem:[%s2414_s28 + $0x1d4] ss:$8 sps:$4 sm:$0xff]   ;;  %v2308_v6 = vld [vmem:[%s2414_s28 + $0xd0] ss:$8 sps:$4 sm:$0xff]   ;;  %v2310_v8 = vld [vmem:[%s2414_s28 + $0xe4] ss:$8 sps:$4 sm:$0xff]  }
  0x2c   : > { %912 = vmatpush1.bf16.msra.mxu0 %v2448_v16  ;;  %2188 = vmatpush1.bf16.msra.mxu1 %v2448_v16  ;;  %v2309_v7 = vld [vmem:[%s2414_s28 + $0x1d0] ss:$8 sps:$4 sm:$0xff]   ;;  %v2312_v9 = vld [vmem:[%s2414_s28 + $0x1e4] ss:$8 sps:$4 sm:$0xff]   ;;  %v2314_v10 = vld [vmem:[%s2414_s28 + $0xe0] ss:$8 sps:$4 sm:$0xff]  }
  0x2d   : > { %v2315_v11 = vld [vmem:[%s2414_s28 + $0x1e0] ss:$8 sps:$4 sm:$0xff]   ;;  %v2316_v12 = vld [vmem:[%s2414_s28 + $0xf4] ss:$8 sps:$4 sm:$0xff]   ;;  %v2320_v14 = vld [vmem:[%s2414_s28 + $0xf0] ss:$8 sps:$4 sm:$0xff]  }
  0x2e   : > { %v2318_v13 = vld [vmem:[%s2414_s28 + $0x1f4] ss:$8 sps:$4 sm:$0xff]   ;;  %v2321_v15 = vld [vmem:[%s2414_s28 + $0x1f0] ss:$8 sps:$4 sm:$0xff]   ;;  %v297_v16 = vld [vmem:[#allocation2] sm:$0xff] }
  0x2f   : > { %926 = vmatmul.mubr.bf16.vlgmr.msra.gmra.mrb[0].mxu0 %v2226_v18  ;;  %1054 = vmatmul.mubr.bf16.vlgmr.msra.gmra.mrb[0].mxu1 %v2229_v19  ;;  %v329_v17 = vld [vmem:[#allocation2 + $0x100] sm:$0xff] }
  0x30   : > { %2006 = vmatprep.mubr.msk.bf16.mxu0 %vm789_vm0, %v2232_v20  ;;  %2022 = vmatprep.mubr.msk.bf16.mxu1 %vm789_vm0, %v2234_v21  ;;  %v298_v20 = vld [vmem:[#allocation2 + $0x8] sm:$0xff] }
  0x31   : > { %v330_v21 = vld [vmem:[#allocation2 + $0x108] sm:$0xff] }
  0x37   : > { %934 = vmatmul.mubr.bf16.gmra.mrb[4].mxu0 %v2236_v22  ;;  %1062 = vmatmul.mubr.bf16.gmra.mrb[4].mxu1 %v2237_v23 }
  0x38   : > { %2007 = vmatprep.mubr.msk.bf16.mxu0 %vm789_vm0, %v2238_v24  ;;  %2023 = vmatprep.mubr.msk.bf16.mxu1 %vm789_vm0, %v2240_v25 }
  0x3f   : > { %942 = vmatmul.mubr.bf16.gmra.mrb[8].mxu0 %v2242_v26  ;;  %1070 = vmatmul.mubr.bf16.gmra.mrb[8].mxu1 %v2243_v27 }
  0x40   : > { %2008 = vmatprep.mubr.msk.bf16.mxu0 %vm789_vm0, %v2244_v28  ;;  %2024 = vmatprep.mubr.msk.bf16.mxu1 %vm789_vm0, %v2246_v29 }
  0x47   : > { %950 = vmatmul.mubr.bf16.gmra.mrb[12].mxu0 %v2248_v30  ;;  %1078 = vmatmul.mubr.bf16.gmra.mrb[12].mxu1 %v2249_v31 }
  0x48   : > { %2009 = vmatprep.mubr.msk.bf16.mxu0 %vm789_vm0, %v2250_v32  ;;  %2025 = vmatprep.mubr.msk.bf16.mxu1 %vm789_vm0, %v2252_v33  ;;  %v299_v32 = vld [vmem:[#allocation2 + $0x10] sm:$0xff] }
  0x49   : > { %v331_v33 = vld [vmem:[#allocation2 + $0x110] sm:$0xff] }
  0x4f   : > { %958 = vmatmul.mubr.bf16.gmra.mrb[16].mxu0 %v2254_v34  ;;  %1086 = vmatmul.mubr.bf16.gmra.mrb[16].mxu1 %v2255_v35  ;;  %v2681_v34 = vld [vmem:[%s2957_s2] ss:$0 sm:$0xff] }
  0x50   : > { %2010 = vmatprep.mubr.msk.bf16.mxu0 %vm789_vm0, %v2256_v36  ;;  %2026 = vmatprep.mubr.msk.bf16.mxu1 %vm789_vm0, %v2258_v37  ;;  %v300_v37 = vld [vmem:[#allocation2 + $0x18] sm:$0xff] }
  0x57   : > { %966 = vmatmul.mubr.bf16.gmra.mrb[20].mxu0 %v2260_v38  ;;  %1094 = vmatmul.mubr.bf16.gmra.mrb[20].mxu1 %v2261_v39  ;;  %v332_v38 = vld [vmem:[#allocation2 + $0x118] sm:$0xff] }
  0x58   : > { %2011 = vmatprep.mubr.msk.bf16.mxu0 %vm789_vm0, %v2262_v40  ;;  %2027 = vmatprep.mubr.msk.bf16.mxu1 %vm789_vm0, %v2264_v41 }
  0x5f   : > { %974 = vmatmul.mubr.bf16.gmra.mrb[24].mxu0 %v2266_v42  ;;  %1102 = vmatmul.mubr.bf16.gmra.mrb[24].mxu1 %v2267_v43 }
  0x60   : > { %2012 = vmatprep.mubr.msk.bf16.mxu0 %vm789_vm0, %v2268_v44  ;;  %2028 = vmatprep.mubr.msk.bf16.mxu1 %vm789_vm0, %v2270_v45 }
  0x67   : > { %982 = vmatmul.mubr.bf16.gmra.mrb[28].mxu0 %v2272_v46  ;;  %1110 = vmatmul.mubr.bf16.gmra.mrb[28].mxu1 %v2273_v47 }
  0x68   : > { %2013 = vmatprep.mubr.msk.bf16.mxu0 %vm789_vm0, %v2274_v48  ;;  %2029 = vmatprep.mubr.msk.bf16.mxu1 %vm789_vm0, %v2276_v49 }
  0x6f   : > { %990 = vmatmul.mubr.bf16.gmra.mrb[32].mxu0 %v2278_v50  ;;  %1118 = vmatmul.mubr.bf16.gmra.mrb[32].mxu1 %v2279_v51 }
  0x70   : > { %2014 = vmatprep.mubr.msk.bf16.mxu0 %vm789_vm0, %v2280_v52  ;;  %2030 = vmatprep.mubr.msk.bf16.mxu1 %vm789_vm0, %v2282_v53 }
  0x77   : > { %998 = vmatmul.mubr.bf16.gmra.mrb[36].mxu0 %v2284_v54  ;;  %1126 = vmatmul.mubr.bf16.gmra.mrb[36].mxu1 %v2285_v55 }
  0x78   : > { %2015 = vmatprep.mubr.msk.bf16.mxu0 %vm789_vm0, %v2286_v56  ;;  %2031 = vmatprep.mubr.msk.bf16.mxu1 %vm789_vm0, %v2288_v57 }
  0x7f   : > { %1006 = vmatmul.mubr.bf16.gmra.mrb[40].mxu0 %v2290_v58  ;;  %1134 = vmatmul.mubr.bf16.gmra.mrb[40].mxu1 %v2291_v59  ;;  %v301_v59 = vld [vmem:[#allocation2 + $0x20] sm:$0xff] }
  0x80   : > { %2016 = vmatprep.mubr.msk.bf16.mxu0 %vm789_vm0, %v2292_v60  ;;  %2032 = vmatprep.mubr.msk.bf16.mxu1 %vm789_vm0, %v2294_v61  ;;  %v333_v60 = vld [vmem:[#allocation2 + $0x120] sm:$0xff] }
  0x87   : > { %1014 = vmatmul.mubr.bf16.gmra.mrb[44].mxu0 %v2296_v62  ;;  %1142 = vmatmul.mubr.bf16.gmra.mrb[44].mxu1 %v2297_v63 }
  0x88   : > { %2017 = vmatprep.mubr.msk.bf16.mxu0 %vm789_vm0, %v2298_v0  ;;  %2033 = vmatprep.mubr.msk.bf16.mxu1 %vm789_vm0, %v2300_v1 }
  0x8f   : > { %1022 = vmatmul.mubr.bf16.gmra.mrb[48].mxu0 %v2302_v2  ;;  %1150 = vmatmul.mubr.bf16.gmra.mrb[48].mxu1 %v2303_v3  ;;  %v302_v3 = vld [vmem:[#allocation2 + $0x28] sm:$0xff] }
  0x90   : > { %2018 = vmatprep.mubr.msk.bf16.mxu0 %vm789_vm0, %v2304_v4  ;;  %2034 = vmatprep.mubr.msk.bf16.mxu1 %vm789_vm0, %v2306_v5  ;;  %v334_v4 = vld [vmem:[#allocation2 + $0x128] sm:$0xff] }
  0x97   : > { %1030 = vmatmul.mubr.bf16.gmra.mrb[52].mxu0 %v2308_v6  ;;  %1158 = vmatmul.mubr.bf16.gmra.mrb[52].mxu1 %v2309_v7 }
  0x98   : > { %2019 = vmatprep.mubr.msk.bf16.mxu0 %vm789_vm0, %v2310_v8  ;;  %2035 = vmatprep.mubr.msk.bf16.mxu1 %vm789_vm0, %v2312_v9 }
  0x9f   : > { %1038 = vmatmul.mubr.bf16.gmra.mrb[56].mxu0 %v2314_v10  ;;  %1166 = vmatmul.mubr.bf16.gmra.mrb[56].mxu1 %v2315_v11 }
  0xa0   : > { %2020 = vmatprep.mubr.msk.bf16.mxu0 %vm789_vm0, %v2316_v12  ;;  %2036 = vmatprep.mubr.msk.bf16.mxu1 %vm789_vm0, %v2318_v13 }
  0xa7   : > { %1046 = vmatmul.mubr.bf16.gmra.mrb[60].mxu0 %v2320_v14  ;;  %1174 = vmatmul.mubr.bf16.gmra.mrb[60].mxu1 %v2321_v15 }
 0x102   : > { %v927_v18 = vpop.f32.mrb[0].mxu0  ;;  %v1055_v19 = vpop.f32.mrb[0].mxu1 }
 0x103   : > { %v1182_v22 = vadd.f32 %v927_v18, %v297_v16  ;;  %v1214_v23 = vadd.f32 %v1055_v19, %v329_v17  ;;  %v929_v24 = vpop.f32.mrb[1].mxu0  ;;  %v1057_v25 = vpop.f32.mrb[1].mxu1 }
 0x104   : > { %v930_v26 = vpop.f32.mrb[2].mxu0  ;;  %v1058_v27 = vpop.f32.mrb[2].mxu1 }
 0x105   : > { %1247 = vst.msk [vmem:[#allocation2] sm:$0xff] %vm232_vm3, %v1182_v22  ;;  %1279 = vst.msk [vmem:[#allocation2 + $0x100] sm:$0xff] %vm232_vm3, %v1214_v23  ;;  %v1183_v28 = vadd.f32 %v930_v26, %v298_v20  ;;  %v1215_v29 = vadd.f32 %v1058_v27, %v330_v21  ;;  %v932_v30 = vpop.f32.mrb[3].mxu0  ;;  %v1060_v31 = vpop.f32.mrb[3].mxu1  ;;  %v303_v27 = vld [vmem:[#allocation2 + $0x30] sm:$0xff] }
 0x107   : > { %1248 = vst.msk [vmem:[#allocation2 + $0x8] sm:$0xff] %vm232_vm3, %v1183_v28  ;;  %1280 = vst.msk [vmem:[#allocation2 + $0x108] sm:$0xff] %vm232_vm3, %v1215_v29  ;;  %v335_v28 = vld [vmem:[#allocation2 + $0x130] sm:$0xff] }
 0x10a   : > { %v935_v35 = vpop.f32.mrb[4].mxu0  ;;  %v1063_v36 = vpop.f32.mrb[4].mxu1 }
 0x10b   : > { %v1184_v39 = vadd.f32 %v935_v35, %v299_v32  ;;  %v1216_v40 = vadd.f32 %v1063_v36, %v331_v33  ;;  %v937_v41 = vpop.f32.mrb[5].mxu0  ;;  %v1065_v42 = vpop.f32.mrb[5].mxu1  ;;  %v304_v36 = vld [vmem:[#allocation2 + $0x38] sm:$0xff] }
 0x10c   : > { %v1314_v43 = vld [vmem:[#allocation2] sm:$0xff]  ;;  %v938_v45 = vpop.f32.mrb[6].mxu0  ;;  %v1066_v46 = vpop.f32.mrb[6].mxu1 }
 0x10d   : > { %v1346_v44 = vld [vmem:[#allocation2 + $0x100] sm:$0xff]  ;;  %v1385_v47 = vadd.f32 %v2681_v34, %v1314_v43  ;;  %1249 = vst.msk [vmem:[#allocation2 + $0x10] sm:$0xff] %vm232_vm3, %v1184_v39  ;;  %1281 = vst.msk [vmem:[#allocation2 + $0x110] sm:$0xff] %vm232_vm3, %v1216_v40  ;;  %v1185_v49 = vadd.f32 %v938_v45, %v300_v37  ;;  %v1217_v50 = vadd.f32 %v1066_v46, %v332_v38  ;;  %v940_v51 = vpop.f32.mrb[7].mxu0  ;;  %v1068_v52 = vpop.f32.mrb[7].mxu1  ;;  %v336_v37 = vld [vmem:[#allocation2 + $0x138] sm:$0xff] }
 0x10e   : > { %v1417_v48 = vadd.f32 %v2681_v34, %v1346_v44  ;;  %v1315_v53 = vld [vmem:[#allocation2 + $0x8] sm:$0xff] }
 0x10f   : > { %v1347_v54 = vld [vmem:[#allocation2 + $0x108] sm:$0xff]  ;;  %v1449_v55 = vmax.f32 %v1385_v47, 0.0  ;;  %v1386_v57 = vadd.f32 %v2681_v34, %v1315_v53  ;;  %1250 = vst.msk [vmem:[#allocation2 + $0x18] sm:$0xff] %vm232_vm3, %v1185_v49  ;;  %1282 = vst.msk [vmem:[#allocation2 + $0x118] sm:$0xff] %vm232_vm3, %v1217_v50 }
 0x110   : > { %v1481_v56 = vmax.f32 %v1417_v48, 0.0  ;;  %v1418_v58 = vadd.f32 %v2681_v34, %v1347_v54 }
 0x111   : > { %v2105_v61 = vpack.c.bf16 %v1449_v55, %v1449_v55  ;;  %v1450_v63 = vmax.f32 %v1386_v57, 0.0 }
 0x112   : > { %v2137_v62 = vpack.c.bf16 %v1481_v56, %v1481_v56  ;;  %v1482_v0 = vmax.f32 %v1418_v58, 0.0  ;;  %v943_v1 = vpop.f32.mrb[8].mxu0  ;;  %v1071_v2 = vpop.f32.mrb[8].mxu1 }
 0x113   : > { %1770 = vst.msk [vmem:[%s2695_s22] sm:$0xf] %vm1769_vm4, %v2105_v61  ;;  %v2106_v5 = vpack.c.bf16 %v1450_v63, %v1450_v63  ;;  %v1186_v7 = vadd.f32 %v943_v1, %v301_v59  ;;  %v1218_v8 = vadd.f32 %v1071_v2, %v333_v60  ;;  %v945_v9 = vpop.f32.mrb[9].mxu0  ;;  %v1073_v10 = vpop.f32.mrb[9].mxu1  ;;  %v305_v60 = vld [vmem:[#allocation2 + $0x40] sm:$0xff] }
 0x114   : > { %1802 = vst.msk [vmem:[%s2695_s22 + $0x80] sm:$0xf] %vm1769_vm4, %v2137_v62  ;;  %v2138_v6 = vpack.c.bf16 %v1482_v0, %v1482_v0  ;;  %v1316_v11 = vld [vmem:[#allocation2 + $0x10] sm:$0xff]  ;;  %v946_v13 = vpop.f32.mrb[10].mxu0  ;;  %v1074_v14 = vpop.f32.mrb[10].mxu1  ;;  %v337_v61 = vld [vmem:[#allocation2 + $0x140] sm:$0xff] }
 0x115   : > { %v1348_v12 = vld [vmem:[#allocation2 + $0x110] sm:$0xff]  ;;  %1771 = vst.msk [vmem:[%s2695_s22 + $0x4] sm:$0xf] %vm1769_vm4, %v2106_v5  ;;  %v1387_v15 = vadd.f32 %v2681_v34, %v1316_v11  ;;  %v1187_v17 = vadd.f32 %v946_v13, %v302_v3  ;;  %v1219_v18 = vadd.f32 %v1074_v14, %v334_v4  ;;  %v948_v19 = vpop.f32.mrb[11].mxu0  ;;  %v1076_v20 = vpop.f32.mrb[11].mxu1  ;;  %v306_v4 = vld [vmem:[#allocation2 + $0x48] sm:$0xff] }
 0x116   : > { %1803 = vst.msk [vmem:[%s2695_s22 + $0x84] sm:$0xf] %vm1769_vm4, %v2138_v6  ;;  %v1419_v16 = vadd.f32 %v2681_v34, %v1348_v12  ;;  %v1317_v21 = vld [vmem:[#allocation2 + $0x18] sm:$0xff]  ;;  %v338_v5 = vld [vmem:[#allocation2 + $0x148] sm:$0xff] }
 0x117   : > { %1251 = vst.msk [vmem:[#allocation2 + $0x20] sm:$0xff] %vm232_vm3, %v1186_v7  ;;  %1283 = vst.msk [vmem:[#allocation2 + $0x120] sm:$0xff] %vm232_vm3, %v1218_v8  ;;  %v1349_v22 = vld [vmem:[#allocation2 + $0x118] sm:$0xff]  ;;  %v1451_v23 = vmax.f32 %v1387_v15, 0.0  ;;  %v1388_v25 = vadd.f32 %v2681_v34, %v1317_v21 }
 0x118   : > { %v1483_v24 = vmax.f32 %v1419_v16, 0.0  ;;  %v1420_v26 = vadd.f32 %v2681_v34, %v1349_v22  ;;  %1252 = vst.msk [vmem:[#allocation2 + $0x28] sm:$0xff] %vm232_vm3, %v1187_v17  ;;  %1284 = vst.msk [vmem:[#allocation2 + $0x128] sm:$0xff] %vm232_vm3, %v1219_v18 }
 0x119   : > { %v2107_v29 = vpack.c.bf16 %v1451_v23, %v1451_v23  ;;  %v1452_v31 = vmax.f32 %v1388_v25, 0.0 }
 0x11a   : > { %v2139_v30 = vpack.c.bf16 %v1483_v24, %v1483_v24  ;;  %v1484_v32 = vmax.f32 %v1420_v26, 0.0  ;;  %v951_v33 = vpop.f32.mrb[12].mxu0  ;;  %v1079_v35 = vpop.f32.mrb[12].mxu1 }
 0x11b   : > { %1772 = vst.msk [vmem:[%s2695_s22 + $0x8] sm:$0xf] %vm1769_vm4, %v2107_v29  ;;  %v2108_v38 = vpack.c.bf16 %v1452_v31, %v1452_v31  ;;  %v1188_v40 = vadd.f32 %v951_v33, %v303_v27  ;;  %v1220_v41 = vadd.f32 %v1079_v35, %v335_v28  ;;  %v953_v42 = vpop.f32.mrb[13].mxu0  ;;  %v1081_v43 = vpop.f32.mrb[13].mxu1  ;;  %v307_v28 = vld [vmem:[#allocation2 + $0x50] sm:$0xff] }
 0x11c   : > { %1804 = vst.msk [vmem:[%s2695_s22 + $0x88] sm:$0xf] %vm1769_vm4, %v2139_v30  ;;  %v2140_v39 = vpack.c.bf16 %v1484_v32, %v1484_v32  ;;  %v954_v46 = vpop.f32.mrb[14].mxu0  ;;  %v1082_v47 = vpop.f32.mrb[14].mxu1  ;;  %v339_v29 = vld [vmem:[#allocation2 + $0x150] sm:$0xff] }
 0x11d   : > { %1773 = vst.msk [vmem:[%s2695_s22 + $0xc] sm:$0xf] %vm1769_vm4, %v2108_v38  ;;  %v1189_v50 = vadd.f32 %v954_v46, %v304_v36  ;;  %v1221_v51 = vadd.f32 %v1082_v47, %v336_v37  ;;  %v956_v52 = vpop.f32.mrb[15].mxu0  ;;  %v1084_v53 = vpop.f32.mrb[15].mxu1  ;;  %v308_v37 = vld [vmem:[#allocation2 + $0x58] sm:$0xff] }
 0x11e   : > { %v1318_v44 = vld [vmem:[#allocation2 + $0x20] sm:$0xff]  ;;  %1805 = vst.msk [vmem:[%s2695_s22 + $0x8c] sm:$0xf] %vm1769_vm4, %v2140_v39  ;;  %v340_v38 = vld [vmem:[#allocation2 + $0x158] sm:$0xff] }
 0x11f   : > { %v1350_v45 = vld [vmem:[#allocation2 + $0x120] sm:$0xff]  ;;  %v1389_v48 = vadd.f32 %v2681_v34, %v1318_v44  ;;  %1253 = vst.msk [vmem:[#allocation2 + $0x30] sm:$0xff] %vm232_vm3, %v1188_v40  ;;  %1285 = vst.msk [vmem:[#allocation2 + $0x130] sm:$0xff] %vm232_vm3, %v1220_v41  ;;  %v1319_v54 = vld [vmem:[#allocation2 + $0x28] sm:$0xff] }
 0x120   : > { %v1421_v49 = vadd.f32 %v2681_v34, %v1350_v45  ;;  %v1351_v55 = vld [vmem:[#allocation2 + $0x128] sm:$0xff]  ;;  %v1390_v58 = vadd.f32 %v2681_v34, %v1319_v54  ;;  %1254 = vst.msk [vmem:[#allocation2 + $0x38] sm:$0xff] %vm232_vm3, %v1189_v50  ;;  %1286 = vst.msk [vmem:[#allocation2 + $0x138] sm:$0xff] %vm232_vm3, %v1221_v51 }
 0x121   : > { %v1453_v56 = vmax.f32 %v1389_v48, 0.0  ;;  %v1422_v59 = vadd.f32 %v2681_v34, %v1351_v55 }
 0x122   : > { %v1485_v57 = vmax.f32 %v1421_v49, 0.0  ;;  %v1454_v0 = vmax.f32 %v1390_v58, 0.0  ;;  %v959_v2 = vpop.f32.mrb[16].mxu0  ;;  %v1087_v3 = vpop.f32.mrb[16].mxu1 }
 0x123   : > { %v2109_v62 = vpack.c.bf16 %v1453_v56, %v1453_v56  ;;  %v1486_v1 = vmax.f32 %v1422_v59, 0.0  ;;  %v1190_v8 = vadd.f32 %v959_v2, %v305_v60  ;;  %v1222_v9 = vadd.f32 %v1087_v3, %v337_v61  ;;  %v961_v10 = vpop.f32.mrb[17].mxu0  ;;  %v1089_v11 = vpop.f32.mrb[17].mxu1  ;;  %v309_v61 = vld [vmem:[#allocation2 + $0x60] sm:$0xff] }
 0x124   : > { %v2141_v63 = vpack.c.bf16 %v1485_v57, %v1485_v57  ;;  %v2110_v6 = vpack.c.bf16 %v1454_v0, %v1454_v0  ;;  %v962_v14 = vpop.f32.mrb[18].mxu0  ;;  %v1090_v15 = vpop.f32.mrb[18].mxu1 }
 0x125   : > { %1774 = vst.msk [vmem:[%s2695_s22 + $0x10] sm:$0xf] %vm1769_vm4, %v2109_v62  ;;  %v2142_v7 = vpack.c.bf16 %v1486_v1, %v1486_v1  ;;  %v1191_v18 = vadd.f32 %v962_v14, %v306_v4  ;;  %v1223_v19 = vadd.f32 %v1090_v15, %v338_v5  ;;  %v964_v20 = vpop.f32.mrb[19].mxu0  ;;  %v1092_v21 = vpop.f32.mrb[19].mxu1  ;;  %v341_v62 = vld [vmem:[#allocation2 + $0x160] sm:$0xff]  ;;  %v310_v5 = vld [vmem:[#allocation2 + $0x68] sm:$0xff] }
 0x126   : > { %1806 = vst.msk [vmem:[%s2695_s22 + $0x90] sm:$0xf] %vm1769_vm4, %v2141_v63  ;;  %v1320_v12 = vld [vmem:[#allocation2 + $0x30] sm:$0xff]  ;;  %1775 = vst.msk [vmem:[%s2695_s22 + $0x14] sm:$0xf] %vm1769_vm4, %v2110_v6  ;;  %v342_v6 = vld [vmem:[#allocation2 + $0x168] sm:$0xff] }
 0x127   : > { %v1352_v13 = vld [vmem:[#allocation2 + $0x130] sm:$0xff]  ;;  %1807 = vst.msk [vmem:[%s2695_s22 + $0x94] sm:$0xf] %vm1769_vm4, %v2142_v7  ;;  %v1391_v16 = vadd.f32 %v2681_v34, %v1320_v12  ;;  %v1321_v22 = vld [vmem:[#allocation2 + $0x38] sm:$0xff] }
 0x128   : > { %v1423_v17 = vadd.f32 %v2681_v34, %v1352_v13  ;;  %1255 = vst.msk [vmem:[#allocation2 + $0x40] sm:$0xff] %vm232_vm3, %v1190_v8  ;;  %1287 = vst.msk [vmem:[#allocation2 + $0x140] sm:$0xff] %vm232_vm3, %v1222_v9  ;;  %v1353_v23 = vld [vmem:[#allocation2 + $0x138] sm:$0xff]  ;;  %v1392_v26 = vadd.f32 %v2681_v34, %v1321_v22 }
 0x129   : > { %v1455_v24 = vmax.f32 %v1391_v16, 0.0  ;;  %v1424_v27 = vadd.f32 %v2681_v34, %v1353_v23  ;;  %1256 = vst.msk [vmem:[#allocation2 + $0x48] sm:$0xff] %vm232_vm3, %v1191_v18  ;;  %1288 = vst.msk [vmem:[#allocation2 + $0x148] sm:$0xff] %vm232_vm3, %v1223_v19 }
 0x12a   : > { %v1487_v25 = vmax.f32 %v1423_v17, 0.0  ;;  %v1456_v32 = vmax.f32 %v1392_v26, 0.0  ;;  %v967_v35 = vpop.f32.mrb[20].mxu0  ;;  %v1095_v36 = vpop.f32.mrb[20].mxu1 }
 0x12b   : > { %v2111_v30 = vpack.c.bf16 %v1455_v24, %v1455_v24  ;;  %v1488_v33 = vmax.f32 %v1424_v27, 0.0  ;;  %v1192_v41 = vadd.f32 %v967_v35, %v307_v28  ;;  %v1224_v42 = vadd.f32 %v1095_v36, %v339_v29  ;;  %v969_v43 = vpop.f32.mrb[21].mxu0  ;;  %v1097_v44 = vpop.f32.mrb[21].mxu1  ;;  %v311_v29 = vld [vmem:[#allocation2 + $0x70] sm:$0xff] }
 0x12c   : > { %v2143_v31 = vpack.c.bf16 %v1487_v25, %v1487_v25  ;;  %v2112_v39 = vpack.c.bf16 %v1456_v32, %v1456_v32  ;;  %v970_v47 = vpop.f32.mrb[22].mxu0  ;;  %v1098_v48 = vpop.f32.mrb[22].mxu1 }
 0x12d   : > { %1776 = vst.msk [vmem:[%s2695_s22 + $0x18] sm:$0xf] %vm1769_vm4, %v2111_v30  ;;  %v2144_v40 = vpack.c.bf16 %v1488_v33, %v1488_v33  ;;  %v1193_v51 = vadd.f32 %v970_v47, %v308_v37  ;;  %v1225_v52 = vadd.f32 %v1098_v48, %v340_v38  ;;  %v972_v53 = vpop.f32.mrb[23].mxu0  ;;  %v1100_v54 = vpop.f32.mrb[23].mxu1  ;;  %v343_v30 = vld [vmem:[#allocation2 + $0x170] sm:$0xff]  ;;  %v312_v38 = vld [vmem:[#allocation2 + $0x78] sm:$0xff] }
 0x12e   : > { %1808 = vst.msk [vmem:[%s2695_s22 + $0x98] sm:$0xf] %vm1769_vm4, %v2143_v31  ;;  %1777 = vst.msk [vmem:[%s2695_s22 + $0x1c] sm:$0xf] %vm1769_vm4, %v2112_v39  ;;  %v344_v39 = vld [vmem:[#allocation2 + $0x178] sm:$0xff] }
 0x12f   : > { %v1322_v45 = vld [vmem:[#allocation2 + $0x40] sm:$0xff]  ;;  %1809 = vst.msk [vmem:[%s2695_s22 + $0x9c] sm:$0xf] %vm1769_vm4, %v2144_v40 }
 0x130   : > { %v1354_v46 = vld [vmem:[#allocation2 + $0x140] sm:$0xff]  ;;  %v1393_v49 = vadd.f32 %v2681_v34, %v1322_v45  ;;  %1257 = vst.msk [vmem:[#allocation2 + $0x50] sm:$0xff] %vm232_vm3, %v1192_v41  ;;  %1289 = vst.msk [vmem:[#allocation2 + $0x150] sm:$0xff] %vm232_vm3, %v1224_v42  ;;  %v1323_v55 = vld [vmem:[#allocation2 + $0x48] sm:$0xff] }
 0x131   : > { %v1425_v50 = vadd.f32 %v2681_v34, %v1354_v46  ;;  %v1355_v56 = vld [vmem:[#allocation2 + $0x148] sm:$0xff]  ;;  %v1394_v59 = vadd.f32 %v2681_v34, %v1323_v55  ;;  %1258 = vst.msk [vmem:[#allocation2 + $0x58] sm:$0xff] %vm232_vm3, %v1193_v51  ;;  %1290 = vst.msk [vmem:[#allocation2 + $0x158] sm:$0xff] %vm232_vm3, %v1225_v52 }
 0x132   : > { %v1457_v57 = vmax.f32 %v1393_v49, 0.0  ;;  %v1426_v60 = vadd.f32 %v2681_v34, %v1355_v56  ;;  %v975_v3 = vpop.f32.mrb[24].mxu0  ;;  %v1103_v4 = vpop.f32.mrb[24].mxu1 }
 0x133   : > { %v1489_v58 = vmax.f32 %v1425_v50, 0.0  ;;  %v1458_v1 = vmax.f32 %v1394_v59, 0.0  ;;  %v1194_v9 = vadd.f32 %v975_v3, %v309_v61  ;;  %v1226_v10 = vadd.f32 %v1103_v4, %v341_v62  ;;  %v977_v11 = vpop.f32.mrb[25].mxu0  ;;  %v1105_v12 = vpop.f32.mrb[25].mxu1  ;;  %v313_v62 = vld [vmem:[#allocation2 + $0x80] sm:$0xff] }
 0x134   : > { %v2113_v63 = vpack.c.bf16 %v1457_v57, %v1457_v57  ;;  %v1490_v2 = vmax.f32 %v1426_v60, 0.0  ;;  %v978_v15 = vpop.f32.mrb[26].mxu0  ;;  %v1106_v16 = vpop.f32.mrb[26].mxu1 }
 0x135   : > { %v2145_v0 = vpack.c.bf16 %v1489_v58, %v1489_v58  ;;  %v2114_v7 = vpack.c.bf16 %v1458_v1, %v1458_v1  ;;  %1259 = vst.msk [vmem:[#allocation2 + $0x60] sm:$0xff] %vm232_vm3, %v1194_v9  ;;  %1291 = vst.msk [vmem:[#allocation2 + $0x160] sm:$0xff] %vm232_vm3, %v1226_v10  ;;  %v1195_v19 = vadd.f32 %v978_v15, %v310_v5  ;;  %v980_v21 = vpop.f32.mrb[27].mxu0  ;;  %v1108_v22 = vpop.f32.mrb[27].mxu1 }
 0x136   : > { %1778 = vst.msk [vmem:[%s2695_s22 + $0x20] sm:$0xf] %vm1769_vm4, %v2113_v63  ;;  %v2146_v8 = vpack.c.bf16 %v1490_v2, %v1490_v2  ;;  %v1227_v20 = vadd.f32 %v1106_v16, %v342_v6  ;;  %v345_v63 = vld [vmem:[#allocation2 + $0x180] sm:$0xff]  ;;  %v314_v6 = vld [vmem:[#allocation2 + $0x88] sm:$0xff] }
 0x137   : > { %1810 = vst.msk [vmem:[%s2695_s22 + $0xa0] sm:$0xf] %vm1769_vm4, %v2145_v0  ;;  %v1324_v13 = vld [vmem:[#allocation2 + $0x50] sm:$0xff]  ;;  %1779 = vst.msk [vmem:[%s2695_s22 + $0x24] sm:$0xf] %vm1769_vm4, %v2114_v7  ;;  %v346_v7 = vld [vmem:[#allocation2 + $0x188] sm:$0xff] }
 0x138   : > { %v1356_v14 = vld [vmem:[#allocation2 + $0x150] sm:$0xff]  ;;  %1811 = vst.msk [vmem:[%s2695_s22 + $0xa4] sm:$0xf] %vm1769_vm4, %v2146_v8  ;;  %v1395_v17 = vadd.f32 %v2681_v34, %v1324_v13  ;;  %v1325_v23 = vld [vmem:[#allocation2 + $0x58] sm:$0xff] }
 0x139   : > { %v1427_v18 = vadd.f32 %v2681_v34, %v1356_v14  ;;  %v1357_v24 = vld [vmem:[#allocation2 + $0x158] sm:$0xff]  ;;  %v1396_v27 = vadd.f32 %v2681_v34, %v1325_v23  ;;  %1260 = vst.msk [vmem:[#allocation2 + $0x68] sm:$0xff] %vm232_vm3, %v1195_v19  ;;  %1292 = vst.msk [vmem:[#allocation2 + $0x168] sm:$0xff] %vm232_vm3, %v1227_v20 }
 0x13a   : > { %v1459_v25 = vmax.f32 %v1395_v17, 0.0  ;;  %v1428_v28 = vadd.f32 %v2681_v34, %v1357_v24  ;;  %v983_v36 = vpop.f32.mrb[28].mxu0  ;;  %v1111_v37 = vpop.f32.mrb[28].mxu1 }
 0x13b   : > { %v1491_v26 = vmax.f32 %v1427_v18, 0.0  ;;  %v1460_v33 = vmax.f32 %v1396_v27, 0.0  ;;  %v1196_v42 = vadd.f32 %v983_v36, %v311_v29  ;;  %v1228_v43 = vadd.f32 %v1111_v37, %v343_v30  ;;  %v985_v44 = vpop.f32.mrb[29].mxu0  ;;  %v1113_v45 = vpop.f32.mrb[29].mxu1  ;;  %v315_v30 = vld [vmem:[#allocation2 + $0x90] sm:$0xff] }
 0x13c   : > { %v2115_v31 = vpack.c.bf16 %v1459_v25, %v1459_v25  ;;  %v1492_v35 = vmax.f32 %v1428_v28, 0.0  ;;  %v1326_v46 = vld [vmem:[#allocation2 + $0x60] sm:$0xff]  ;;  %v986_v48 = vpop.f32.mrb[30].mxu0  ;;  %v1114_v49 = vpop.f32.mrb[30].mxu1 }
 0x13d   : > { %v2147_v32 = vpack.c.bf16 %v1491_v26, %v1491_v26  ;;  %v2116_v40 = vpack.c.bf16 %v1460_v33, %v1460_v33  ;;  %v1358_v47 = vld [vmem:[#allocation2 + $0x160] sm:$0xff]  ;;  %v1397_v50 = vadd.f32 %v2681_v34, %v1326_v46  ;;  %1261 = vst.msk [vmem:[#allocation2 + $0x70] sm:$0xff] %vm232_vm3, %v1196_v42  ;;  %1293 = vst.msk [vmem:[#allocation2 + $0x170] sm:$0xff] %vm232_vm3, %v1228_v43  ;;  %v988_v54 = vpop.f32.mrb[31].mxu0  ;;  %v1116_v55 = vpop.f32.mrb[31].mxu1 }
 0x13e   : > { %1780 = vst.msk [vmem:[%s2695_s22 + $0x28] sm:$0xf] %vm1769_vm4, %v2115_v31  ;;  %v2148_v41 = vpack.c.bf16 %v1492_v35, %v1492_v35  ;;  %v1429_v51 = vadd.f32 %v2681_v34, %v1358_v47  ;;  %v1197_v52 = vadd.f32 %v986_v48, %v312_v38  ;;  %v1229_v53 = vadd.f32 %v1114_v49, %v344_v39  ;;  %v347_v31 = vld [vmem:[#allocation2 + $0x190] sm:$0xff]  ;;  %v316_v39 = vld [vmem:[#allocation2 + $0x98] sm:$0xff] }
 0x13f   : > { %1812 = vst.msk [vmem:[%s2695_s22 + $0xa8] sm:$0xf] %vm1769_vm4, %v2147_v32  ;;  %1781 = vst.msk [vmem:[%s2695_s22 + $0x2c] sm:$0xf] %vm1769_vm4, %v2116_v40  ;;  %v1461_v58 = vmax.f32 %v1397_v50, 0.0  ;;  %v348_v40 = vld [vmem:[#allocation2 + $0x198] sm:$0xff] }
 0x140   : > { %1813 = vst.msk [vmem:[%s2695_s22 + $0xac] sm:$0xf] %vm1769_vm4, %v2148_v41  ;;  %v1327_v56 = vld [vmem:[#allocation2 + $0x68] sm:$0xff]  ;;  %v1493_v59 = vmax.f32 %v1429_v51, 0.0 }
 0x141   : > { %v1359_v57 = vld [vmem:[#allocation2 + $0x168] sm:$0xff]  ;;  %v1398_v60 = vadd.f32 %v2681_v34, %v1327_v56  ;;  %1262 = vst.msk [vmem:[#allocation2 + $0x78] sm:$0xff] %vm232_vm3, %v1197_v52  ;;  %1294 = vst.msk [vmem:[#allocation2 + $0x178] sm:$0xff] %vm232_vm3, %v1229_v53  ;;  %v2117_v0 = vpack.c.bf16 %v1461_v58, %v1461_v58 }
 0x142   : > { %v1430_v61 = vadd.f32 %v2681_v34, %v1359_v57  ;;  %v2149_v1 = vpack.c.bf16 %v1493_v59, %v1493_v59  ;;  %v991_v4 = vpop.f32.mrb[32].mxu0  ;;  %v1119_v5 = vpop.f32.mrb[32].mxu1 }
 0x143   : > { %v1462_v2 = vmax.f32 %v1398_v60, 0.0  ;;  %1782 = vst.msk [vmem:[%s2695_s22 + $0x30] sm:$0xf] %vm1769_vm4, %v2117_v0  ;;  %v1198_v10 = vadd.f32 %v991_v4, %v313_v62  ;;  %v1230_v11 = vadd.f32 %v1119_v5, %v345_v63  ;;  %v993_v12 = vpop.f32.mrb[33].mxu0  ;;  %v1121_v13 = vpop.f32.mrb[33].mxu1  ;;  %v317_v63 = vld [vmem:[#allocation2 + $0xa0] sm:$0xff] }
 0x144   : > { %v1494_v3 = vmax.f32 %v1430_v61, 0.0  ;;  %1814 = vst.msk [vmem:[%s2695_s22 + $0xb0] sm:$0xf] %vm1769_vm4, %v2149_v1  ;;  %v1328_v14 = vld [vmem:[#allocation2 + $0x70] sm:$0xff]  ;;  %v994_v16 = vpop.f32.mrb[34].mxu0  ;;  %v1122_v17 = vpop.f32.mrb[34].mxu1 }
 0x145   : > { %v2118_v8 = vpack.c.bf16 %v1462_v2, %v1462_v2  ;;  %v1360_v15 = vld [vmem:[#allocation2 + $0x170] sm:$0xff]  ;;  %v1399_v18 = vadd.f32 %v2681_v34, %v1328_v14  ;;  %1263 = vst.msk [vmem:[#allocation2 + $0x80] sm:$0xff] %vm232_vm3, %v1198_v10  ;;  %1295 = vst.msk [vmem:[#allocation2 + $0x180] sm:$0xff] %vm232_vm3, %v1230_v11  ;;  %v1199_v20 = vadd.f32 %v994_v16, %v314_v6  ;;  %v996_v22 = vpop.f32.mrb[35].mxu0  ;;  %v1124_v23 = vpop.f32.mrb[35].mxu1  ;;  %v349_v0 = vld [vmem:[#allocation2 + $0x1a0] sm:$0xff] }
 0x146   : > { %v2150_v9 = vpack.c.bf16 %v1494_v3, %v1494_v3  ;;  %v1431_v19 = vadd.f32 %v2681_v34, %v1360_v15  ;;  %v1231_v21 = vadd.f32 %v1122_v17, %v346_v7  ;;  %v318_v7 = vld [vmem:[#allocation2 + $0xa8] sm:$0xff] }
 0x147   : > { %1783 = vst.msk [vmem:[%s2695_s22 + $0x34] sm:$0xf] %vm1769_vm4, %v2118_v8  ;;  %v1463_v26 = vmax.f32 %v1399_v18, 0.0  ;;  %v350_v8 = vld [vmem:[#allocation2 + $0x1a8] sm:$0xff] }
 0x148   : > { %1815 = vst.msk [vmem:[%s2695_s22 + $0xb4] sm:$0xf] %vm1769_vm4, %v2150_v9  ;;  %v1329_v24 = vld [vmem:[#allocation2 + $0x78] sm:$0xff]  ;;  %v1495_v27 = vmax.f32 %v1431_v19, 0.0 }
 0x149   : > { %v1361_v25 = vld [vmem:[#allocation2 + $0x178] sm:$0xff]  ;;  %v1400_v28 = vadd.f32 %v2681_v34, %v1329_v24  ;;  %1264 = vst.msk [vmem:[#allocation2 + $0x88] sm:$0xff] %vm232_vm3, %v1199_v20  ;;  %1296 = vst.msk [vmem:[#allocation2 + $0x188] sm:$0xff] %vm232_vm3, %v1231_v21  ;;  %v2119_v32 = vpack.c.bf16 %v1463_v26, %v1463_v26 }
 0x14a   : > { %v1432_v29 = vadd.f32 %v2681_v34, %v1361_v25  ;;  %v2151_v33 = vpack.c.bf16 %v1495_v27, %v1495_v27  ;;  %v999_v37 = vpop.f32.mrb[36].mxu0  ;;  %v1127_v38 = vpop.f32.mrb[36].mxu1 }
 0x14b   : > { %v1464_v35 = vmax.f32 %v1400_v28, 0.0  ;;  %1784 = vst.msk [vmem:[%s2695_s22 + $0x38] sm:$0xf] %vm1769_vm4, %v2119_v32  ;;  %v1200_v43 = vadd.f32 %v999_v37, %v315_v30  ;;  %v1232_v44 = vadd.f32 %v1127_v38, %v347_v31  ;;  %v1001_v45 = vpop.f32.mrb[37].mxu0  ;;  %v1129_v46 = vpop.f32.mrb[37].mxu1  ;;  %v319_v31 = vld [vmem:[#allocation2 + $0xb0] sm:$0xff] }
 0x14c   : > { %v1496_v36 = vmax.f32 %v1432_v29, 0.0  ;;  %1816 = vst.msk [vmem:[%s2695_s22 + $0xb8] sm:$0xf] %vm1769_vm4, %v2151_v33  ;;  %v1330_v47 = vld [vmem:[#allocation2 + $0x80] sm:$0xff]  ;;  %v1002_v49 = vpop.f32.mrb[38].mxu0  ;;  %v1130_v50 = vpop.f32.mrb[38].mxu1 }
 0x14d   : > { %v2120_v41 = vpack.c.bf16 %v1464_v35, %v1464_v35  ;;  %v1362_v48 = vld [vmem:[#allocation2 + $0x180] sm:$0xff]  ;;  %v1401_v51 = vadd.f32 %v2681_v34, %v1330_v47  ;;  %1265 = vst.msk [vmem:[#allocation2 + $0x90] sm:$0xff] %vm232_vm3, %v1200_v43  ;;  %1297 = vst.msk [vmem:[#allocation2 + $0x190] sm:$0xff] %vm232_vm3, %v1232_v44  ;;  %v1201_v53 = vadd.f32 %v1002_v49, %v316_v39  ;;  %v1004_v55 = vpop.f32.mrb[39].mxu0  ;;  %v1132_v56 = vpop.f32.mrb[39].mxu1  ;;  %v351_v32 = vld [vmem:[#allocation2 + $0x1b0] sm:$0xff] }
 0x14e   : > { %v2152_v42 = vpack.c.bf16 %v1496_v36, %v1496_v36  ;;  %v1433_v52 = vadd.f32 %v2681_v34, %v1362_v48  ;;  %v1233_v54 = vadd.f32 %v1130_v50, %v348_v40  ;;  %v320_v40 = vld [vmem:[#allocation2 + $0xb8] sm:$0xff] }
 0x14f   : > { %1785 = vst.msk [vmem:[%s2695_s22 + $0x3c] sm:$0xf] %vm1769_vm4, %v2120_v41  ;;  %v1465_v59 = vmax.f32 %v1401_v51, 0.0  ;;  %v352_v41 = vld [vmem:[#allocation2 + $0x1b8] sm:$0xff] }
 0x150   : > { %1817 = vst.msk [vmem:[%s2695_s22 + $0xbc] sm:$0xf] %vm1769_vm4, %v2152_v42  ;;  %v1331_v57 = vld [vmem:[#allocation2 + $0x88] sm:$0xff]  ;;  %v1497_v60 = vmax.f32 %v1433_v52, 0.0 }
 0x151   : > { %v1363_v58 = vld [vmem:[#allocation2 + $0x188] sm:$0xff]  ;;  %v1402_v61 = vadd.f32 %v2681_v34, %v1331_v57  ;;  %1266 = vst.msk [vmem:[#allocation2 + $0x98] sm:$0xff] %vm232_vm3, %v1201_v53  ;;  %1298 = vst.msk [vmem:[#allocation2 + $0x198] sm:$0xff] %vm232_vm3, %v1233_v54  ;;  %v2121_v1 = vpack.c.bf16 %v1465_v59, %v1465_v59 }
 0x152   : > { %v1434_v62 = vadd.f32 %v2681_v34, %v1363_v58  ;;  %v2153_v2 = vpack.c.bf16 %v1497_v60, %v1497_v60  ;;  %v1007_v5 = vpop.f32.mrb[40].mxu0  ;;  %v1135_v6 = vpop.f32.mrb[40].mxu1 }
 0x153   : > { %v1466_v3 = vmax.f32 %v1402_v61, 0.0  ;;  %1786 = vst.msk [vmem:[%s2695_s22 + $0x40] sm:$0xf] %vm1769_vm4, %v2121_v1  ;;  %v1202_v11 = vadd.f32 %v1007_v5, %v317_v63  ;;  %v1234_v12 = vadd.f32 %v1135_v6, %v349_v0  ;;  %v1009_v13 = vpop.f32.mrb[41].mxu0  ;;  %v1137_v14 = vpop.f32.mrb[41].mxu1  ;;  %v321_v0 = vld [vmem:[#allocation2 + $0xc0] sm:$0xff] }
 0x154   : > { %v1498_v4 = vmax.f32 %v1434_v62, 0.0  ;;  %1818 = vst.msk [vmem:[%s2695_s22 + $0xc0] sm:$0xf] %vm1769_vm4, %v2153_v2  ;;  %v1332_v15 = vld [vmem:[#allocation2 + $0x90] sm:$0xff]  ;;  %v1010_v17 = vpop.f32.mrb[42].mxu0  ;;  %v1138_v18 = vpop.f32.mrb[42].mxu1 }
 0x155   : > { %v2122_v9 = vpack.c.bf16 %v1466_v3, %v1466_v3  ;;  %v1364_v16 = vld [vmem:[#allocation2 + $0x190] sm:$0xff]  ;;  %v1403_v19 = vadd.f32 %v2681_v34, %v1332_v15  ;;  %1267 = vst.msk [vmem:[#allocation2 + $0xa0] sm:$0xff] %vm232_vm3, %v1202_v11  ;;  %1299 = vst.msk [vmem:[#allocation2 + $0x1a0] sm:$0xff] %vm232_vm3, %v1234_v12  ;;  %v1203_v21 = vadd.f32 %v1010_v17, %v318_v7  ;;  %v1012_v23 = vpop.f32.mrb[43].mxu0  ;;  %v1140_v24 = vpop.f32.mrb[43].mxu1  ;;  %v353_v1 = vld [vmem:[#allocation2 + $0x1c0] sm:$0xff] }
 0x156   : > { %v2154_v10 = vpack.c.bf16 %v1498_v4, %v1498_v4  ;;  %v1435_v20 = vadd.f32 %v2681_v34, %v1364_v16  ;;  %v1235_v22 = vadd.f32 %v1138_v18, %v350_v8  ;;  %v322_v8 = vld [vmem:[#allocation2 + $0xc8] sm:$0xff] }
 0x157   : > { %1787 = vst.msk [vmem:[%s2695_s22 + $0x44] sm:$0xf] %vm1769_vm4, %v2122_v9  ;;  %v1467_v27 = vmax.f32 %v1403_v19, 0.0  ;;  %v354_v9 = vld [vmem:[#allocation2 + $0x1c8] sm:$0xff] }
 0x158   : > { %1819 = vst.msk [vmem:[%s2695_s22 + $0xc4] sm:$0xf] %vm1769_vm4, %v2154_v10  ;;  %v1333_v25 = vld [vmem:[#allocation2 + $0x98] sm:$0xff]  ;;  %v1499_v28 = vmax.f32 %v1435_v20, 0.0 }
 0x159   : > { %v1365_v26 = vld [vmem:[#allocation2 + $0x198] sm:$0xff]  ;;  %v1404_v29 = vadd.f32 %v2681_v34, %v1333_v25  ;;  %1268 = vst.msk [vmem:[#allocation2 + $0xa8] sm:$0xff] %vm232_vm3, %v1203_v21  ;;  %1300 = vst.msk [vmem:[#allocation2 + $0x1a8] sm:$0xff] %vm232_vm3, %v1235_v22  ;;  %v2123_v33 = vpack.c.bf16 %v1467_v27, %v1467_v27 }
 0x15a   : > { %v1436_v30 = vadd.f32 %v2681_v34, %v1365_v26  ;;  %v2155_v35 = vpack.c.bf16 %v1499_v28, %v1499_v28  ;;  %v1015_v38 = vpop.f32.mrb[44].mxu0  ;;  %v1143_v39 = vpop.f32.mrb[44].mxu1 }
 0x15b   : > { %v1468_v36 = vmax.f32 %v1404_v29, 0.0  ;;  %1788 = vst.msk [vmem:[%s2695_s22 + $0x48] sm:$0xf] %vm1769_vm4, %v2123_v33  ;;  %v1204_v44 = vadd.f32 %v1015_v38, %v319_v31  ;;  %v1236_v45 = vadd.f32 %v1143_v39, %v351_v32  ;;  %v1017_v46 = vpop.f32.mrb[45].mxu0  ;;  %v1145_v47 = vpop.f32.mrb[45].mxu1  ;;  %v323_v32 = vld [vmem:[#allocation2 + $0xd0] sm:$0xff] }
 0x15c   : > { %v1500_v37 = vmax.f32 %v1436_v30, 0.0  ;;  %1820 = vst.msk [vmem:[%s2695_s22 + $0xc8] sm:$0xf] %vm1769_vm4, %v2155_v35  ;;  %v1334_v48 = vld [vmem:[#allocation2 + $0xa0] sm:$0xff]  ;;  %v1018_v50 = vpop.f32.mrb[46].mxu0  ;;  %v1146_v51 = vpop.f32.mrb[46].mxu1 }
 0x15d   : > { %v2124_v42 = vpack.c.bf16 %v1468_v36, %v1468_v36  ;;  %v1366_v49 = vld [vmem:[#allocation2 + $0x1a0] sm:$0xff]  ;;  %v1405_v52 = vadd.f32 %v2681_v34, %v1334_v48  ;;  %1269 = vst.msk [vmem:[#allocation2 + $0xb0] sm:$0xff] %vm232_vm3, %v1204_v44  ;;  %1301 = vst.msk [vmem:[#allocation2 + $0x1b0] sm:$0xff] %vm232_vm3, %v1236_v45  ;;  %v1205_v54 = vadd.f32 %v1018_v50, %v320_v40  ;;  %v1020_v56 = vpop.f32.mrb[47].mxu0  ;;  %v1148_v57 = vpop.f32.mrb[47].mxu1  ;;  %v355_v33 = vld [vmem:[#allocation2 + $0x1d0] sm:$0xff] }
 0x15e   : > { %v2156_v43 = vpack.c.bf16 %v1500_v37, %v1500_v37  ;;  %v1437_v53 = vadd.f32 %v2681_v34, %v1366_v49  ;;  %v1237_v55 = vadd.f32 %v1146_v51, %v352_v41  ;;  %v324_v41 = vld [vmem:[#allocation2 + $0xd8] sm:$0xff] }
 0x15f   : > { %1789 = vst.msk [vmem:[%s2695_s22 + $0x4c] sm:$0xf] %vm1769_vm4, %v2124_v42  ;;  %v1469_v60 = vmax.f32 %v1405_v52, 0.0  ;;  %v356_v42 = vld [vmem:[#allocation2 + $0x1d8] sm:$0xff] }
 0x160   : > { %1821 = vst.msk [vmem:[%s2695_s22 + $0xcc] sm:$0xf] %vm1769_vm4, %v2156_v43  ;;  %v1335_v58 = vld [vmem:[#allocation2 + $0xa8] sm:$0xff]  ;;  %v1501_v61 = vmax.f32 %v1437_v53, 0.0 }
 0x161   : > { %v1367_v59 = vld [vmem:[#allocation2 + $0x1a8] sm:$0xff]  ;;  %v1406_v62 = vadd.f32 %v2681_v34, %v1335_v58  ;;  %1270 = vst.msk [vmem:[#allocation2 + $0xb8] sm:$0xff] %vm232_vm3, %v1205_v54  ;;  %1302 = vst.msk [vmem:[#allocation2 + $0x1b8] sm:$0xff] %vm232_vm3, %v1237_v55  ;;  %v2125_v2 = vpack.c.bf16 %v1469_v60, %v1469_v60 }
 0x162   : > { %v1438_v63 = vadd.f32 %v2681_v34, %v1367_v59  ;;  %v2157_v3 = vpack.c.bf16 %v1501_v61, %v1501_v61  ;;  %v1023_v6 = vpop.f32.mrb[48].mxu0  ;;  %v1151_v7 = vpop.f32.mrb[48].mxu1 }
 0x163   : > { %v1470_v4 = vmax.f32 %v1406_v62, 0.0  ;;  %1790 = vst.msk [vmem:[%s2695_s22 + $0x50] sm:$0xf] %vm1769_vm4, %v2125_v2  ;;  %v1206_v12 = vadd.f32 %v1023_v6, %v321_v0  ;;  %v1238_v13 = vadd.f32 %v1151_v7, %v353_v1  ;;  %v1025_v14 = vpop.f32.mrb[49].mxu0  ;;  %v1153_v15 = vpop.f32.mrb[49].mxu1  ;;  %v325_v1 = vld [vmem:[#allocation2 + $0xe0] sm:$0xff] }
 0x164   : > { %v1502_v5 = vmax.f32 %v1438_v63, 0.0  ;;  %1822 = vst.msk [vmem:[%s2695_s22 + $0xd0] sm:$0xf] %vm1769_vm4, %v2157_v3  ;;  %v1336_v16 = vld [vmem:[#allocation2 + $0xb0] sm:$0xff]  ;;  %v1026_v18 = vpop.f32.mrb[50].mxu0  ;;  %v1154_v19 = vpop.f32.mrb[50].mxu1 }
 0x165   : > { %v2126_v10 = vpack.c.bf16 %v1470_v4, %v1470_v4  ;;  %v1368_v17 = vld [vmem:[#allocation2 + $0x1b0] sm:$0xff]  ;;  %v1407_v20 = vadd.f32 %v2681_v34, %v1336_v16  ;;  %1271 = vst.msk [vmem:[#allocation2 + $0xc0] sm:$0xff] %vm232_vm3, %v1206_v12  ;;  %1303 = vst.msk [vmem:[#allocation2 + $0x1c0] sm:$0xff] %vm232_vm3, %v1238_v13  ;;  %v1207_v22 = vadd.f32 %v1026_v18, %v322_v8  ;;  %v1028_v24 = vpop.f32.mrb[51].mxu0  ;;  %v1156_v25 = vpop.f32.mrb[51].mxu1  ;;  %v357_v2 = vld [vmem:[#allocation2 + $0x1e0] sm:$0xff] }
 0x166   : > { %v2158_v11 = vpack.c.bf16 %v1502_v5, %v1502_v5  ;;  %v1439_v21 = vadd.f32 %v2681_v34, %v1368_v17  ;;  %v1239_v23 = vadd.f32 %v1154_v19, %v354_v9  ;;  %v326_v9 = vld [vmem:[#allocation2 + $0xe8] sm:$0xff] }
 0x167   : > { %1791 = vst.msk [vmem:[%s2695_s22 + $0x54] sm:$0xf] %vm1769_vm4, %v2126_v10  ;;  %v1471_v28 = vmax.f32 %v1407_v20, 0.0  ;;  %v358_v10 = vld [vmem:[#allocation2 + $0x1e8] sm:$0xff]  ;;  %v2900_v20 = vld [vmem:[%s2957_s2] ss:$0 sm:$0xff] }
 0x168   : > { %1823 = vst.msk [vmem:[%s2695_s22 + $0xd4] sm:$0xf] %vm1769_vm4, %v2158_v11  ;;  %v1337_v26 = vld [vmem:[#allocation2 + $0xb8] sm:$0xff]  ;;  %v1503_v29 = vmax.f32 %v1439_v21, 0.0 }
 0x169   : > { %v1369_v27 = vld [vmem:[#allocation2 + $0x1b8] sm:$0xff]  ;;  %v1408_v30 = vadd.f32 %v2681_v34, %v1337_v26  ;;  %1272 = vst.msk [vmem:[#allocation2 + $0xc8] sm:$0xff] %vm232_vm3, %v1207_v22  ;;  %1304 = vst.msk [vmem:[#allocation2 + $0x1c8] sm:$0xff] %vm232_vm3, %v1239_v23  ;;  %v2127_v35 = vpack.c.bf16 %v1471_v28, %v1471_v28 }
 0x16a   : > { %v1440_v31 = vadd.f32 %v2681_v34, %v1369_v27  ;;  %v2159_v36 = vpack.c.bf16 %v1503_v29, %v1503_v29  ;;  %v1031_v39 = vpop.f32.mrb[52].mxu0  ;;  %v1159_v40 = vpop.f32.mrb[52].mxu1 }
 0x16b   : > { %v1472_v37 = vmax.f32 %v1408_v30, 0.0  ;;  %1792 = vst.msk [vmem:[%s2695_s22 + $0x58] sm:$0xf] %vm1769_vm4, %v2127_v35  ;;  %v1208_v45 = vadd.f32 %v1031_v39, %v323_v32  ;;  %v1240_v46 = vadd.f32 %v1159_v40, %v355_v33  ;;  %v1033_v47 = vpop.f32.mrb[53].mxu0  ;;  %v1161_v48 = vpop.f32.mrb[53].mxu1  ;;  %v327_v33 = vld [vmem:[#allocation2 + $0xf0] sm:$0xff] }
 0x16c   : > { %v1504_v38 = vmax.f32 %v1440_v31, 0.0  ;;  %1824 = vst.msk [vmem:[%s2695_s22 + $0xd8] sm:$0xf] %vm1769_vm4, %v2159_v36  ;;  %v1338_v49 = vld [vmem:[#allocation2 + $0xc0] sm:$0xff]  ;;  %v1034_v51 = vpop.f32.mrb[54].mxu0  ;;  %v1162_v52 = vpop.f32.mrb[54].mxu1 }
 0x16d   : > { %v2128_v43 = vpack.c.bf16 %v1472_v37, %v1472_v37  ;;  %v1370_v50 = vld [vmem:[#allocation2 + $0x1c0] sm:$0xff]  ;;  %v1409_v53 = vadd.f32 %v2681_v34, %v1338_v49  ;;  %1273 = vst.msk [vmem:[#allocation2 + $0xd0] sm:$0xff] %vm232_vm3, %v1208_v45  ;;  %1305 = vst.msk [vmem:[#allocation2 + $0x1d0] sm:$0xff] %vm232_vm3, %v1240_v46  ;;  %v1209_v55 = vadd.f32 %v1034_v51, %v324_v41  ;;  %v1036_v57 = vpop.f32.mrb[55].mxu0  ;;  %v1164_v58 = vpop.f32.mrb[55].mxu1  ;;  %v359_v35 = vld [vmem:[#allocation2 + $0x1f0] sm:$0xff] }
 0x16e   : > { %v2160_v44 = vpack.c.bf16 %v1504_v38, %v1504_v38  ;;  %v1441_v54 = vadd.f32 %v2681_v34, %v1370_v50  ;;  %v1241_v56 = vadd.f32 %v1162_v52, %v356_v42  ;;  %v328_v42 = vld [vmem:[#allocation2 + $0xf8] sm:$0xff] }
 0x16f   : > { %1793 = vst.msk [vmem:[%s2695_s22 + $0x5c] sm:$0xf] %vm1769_vm4, %v2128_v43  ;;  %v1473_v61 = vmax.f32 %v1409_v53, 0.0  ;;  %v360_v43 = vld [vmem:[#allocation2 + $0x1f8] sm:$0xff] }
 0x170   : > { %1825 = vst.msk [vmem:[%s2695_s22 + $0xdc] sm:$0xf] %vm1769_vm4, %v2160_v44  ;;  %v1339_v59 = vld [vmem:[#allocation2 + $0xc8] sm:$0xff]  ;;  %v1505_v62 = vmax.f32 %v1441_v54, 0.0 }
 0x171   : > { %v1371_v60 = vld [vmem:[#allocation2 + $0x1c8] sm:$0xff]  ;;  %v1410_v63 = vadd.f32 %v2681_v34, %v1339_v59  ;;  %1274 = vst.msk [vmem:[#allocation2 + $0xd8] sm:$0xff] %vm232_vm3, %v1209_v55  ;;  %1306 = vst.msk [vmem:[#allocation2 + $0x1d8] sm:$0xff] %vm232_vm3, %v1241_v56  ;;  %v2129_v3 = vpack.c.bf16 %v1473_v61, %v1473_v61 }
 0x172   : > { %v1442_v0 = vadd.f32 %v2681_v34, %v1371_v60  ;;  %v2161_v4 = vpack.c.bf16 %v1505_v62, %v1505_v62  ;;  %v1039_v7 = vpop.f32.mrb[56].mxu0  ;;  %v1167_v8 = vpop.f32.mrb[56].mxu1 }
 0x173   : > { %v1474_v5 = vmax.f32 %v1410_v63, 0.0  ;;  %1794 = vst.msk [vmem:[%s2695_s22 + $0x60] sm:$0xf] %vm1769_vm4, %v2129_v3  ;;  %v1210_v12 = vadd.f32 %v1039_v7, %v325_v1  ;;  %v1242_v13 = vadd.f32 %v1167_v8, %v357_v2  ;;  %v1041_v14 = vpop.f32.mrb[57].mxu0  ;;  %v1169_v15 = vpop.f32.mrb[57].mxu1 }
 0x174   : > { %v1506_v6 = vmax.f32 %v1442_v0, 0.0  ;;  %1826 = vst.msk [vmem:[%s2695_s22 + $0xe0] sm:$0xf] %vm1769_vm4, %v2161_v4  ;;  %v1340_v16 = vld [vmem:[#allocation2 + $0xd0] sm:$0xff]  ;;  %v1042_v18 = vpop.f32.mrb[58].mxu0  ;;  %v1170_v19 = vpop.f32.mrb[58].mxu1 }
 0x175   : > { %v2130_v34 = vpack.c.bf16 %v1474_v5, %v1474_v5  ;;  %v1372_v17 = vld [vmem:[#allocation2 + $0x1d0] sm:$0xff]  ;;  %v1411_v21 = vadd.f32 %v2900_v20, %v1340_v16  ;;  %1275 = vst.msk [vmem:[#allocation2 + $0xe0] sm:$0xff] %vm232_vm3, %v1210_v12  ;;  %1307 = vst.msk [vmem:[#allocation2 + $0x1e0] sm:$0xff] %vm232_vm3, %v1242_v13  ;;  %v1211_v23 = vadd.f32 %v1042_v18, %v326_v9  ;;  %v1044_v25 = vpop.f32.mrb[59].mxu0  ;;  %v1172_v26 = vpop.f32.mrb[59].mxu1 }
 0x176   : > { %v2162_v11 = vpack.c.bf16 %v1506_v6, %v1506_v6  ;;  %v1443_v22 = vadd.f32 %v2900_v20, %v1372_v17  ;;  %v1243_v24 = vadd.f32 %v1170_v19, %v358_v10 }
 0x177   : > { %1795 = vst.msk [vmem:[%s2695_s22 + $0x64] sm:$0xf] %vm1769_vm4, %v2130_v34  ;;  %v1475_v29 = vmax.f32 %v1411_v21, 0.0 }
 0x178   : > { %1827 = vst.msk [vmem:[%s2695_s22 + $0xe4] sm:$0xf] %vm1769_vm4, %v2162_v11  ;;  %v1341_v27 = vld [vmem:[#allocation2 + $0xd8] sm:$0xff]  ;;  %v1507_v30 = vmax.f32 %v1443_v22, 0.0 }
 0x179   : > { %v1373_v28 = vld [vmem:[#allocation2 + $0x1d8] sm:$0xff]  ;;  %v1412_v31 = vadd.f32 %v2900_v20, %v1341_v27  ;;  %1276 = vst.msk [vmem:[#allocation2 + $0xe8] sm:$0xff] %vm232_vm3, %v1211_v23  ;;  %1308 = vst.msk [vmem:[#allocation2 + $0x1e8] sm:$0xff] %vm232_vm3, %v1243_v24  ;;  %v2131_v36 = vpack.c.bf16 %v1475_v29, %v1475_v29 }
 0x17a   : > { %v1444_v32 = vadd.f32 %v2900_v20, %v1373_v28  ;;  %v2163_v37 = vpack.c.bf16 %v1507_v30, %v1507_v30  ;;  %v1047_v40 = vpop.f32.mrb[60].mxu0  ;;  %v1175_v41 = vpop.f32.mrb[60].mxu1 }
 0x17b   : > { %v1476_v38 = vmax.f32 %v1412_v31, 0.0  ;;  %1796 = vst.msk [vmem:[%s2695_s22 + $0x68] sm:$0xf] %vm1769_vm4, %v2131_v36  ;;  %v1212_v46 = vadd.f32 %v1047_v40, %v327_v33  ;;  %v1244_v47 = vadd.f32 %v1175_v41, %v359_v35  ;;  %v1049_v48 = vpop.f32.mrb[61].mxu0  ;;  %v1177_v49 = vpop.f32.mrb[61].mxu1 }
 0x17c   : > { %v1508_v39 = vmax.f32 %v1444_v32, 0.0  ;;  %1828 = vst.msk [vmem:[%s2695_s22 + $0xe8] sm:$0xf] %vm1769_vm4, %v2163_v37  ;;  %v1342_v50 = vld [vmem:[#allocation2 + $0xe0] sm:$0xff]  ;;  %v1050_v52 = vpop.f32.mrb[62].mxu0  ;;  %v1178_v53 = vpop.f32.mrb[62].mxu1 }
 0x17d   : > { %v2132_v44 = vpack.c.bf16 %v1476_v38, %v1476_v38  ;;  %v1374_v51 = vld [vmem:[#allocation2 + $0x1e0] sm:$0xff]  ;;  %v1413_v54 = vadd.f32 %v2900_v20, %v1342_v50  ;;  %1277 = vst.msk [vmem:[#allocation2 + $0xf0] sm:$0xff] %vm232_vm3, %v1212_v46  ;;  %1309 = vst.msk [vmem:[#allocation2 + $0x1f0] sm:$0xff] %vm232_vm3, %v1244_v47  ;;  %v1213_v56 = vadd.f32 %v1050_v52, %v328_v42  ;;  %v1052_v58 = vpop.f32.mrb[63].mxu0  ;;  %v1180_v59 = vpop.f32.mrb[63].mxu1 }
 0x17e   : > { %v2164_v45 = vpack.c.bf16 %v1508_v39, %v1508_v39  ;;  %v1445_v55 = vadd.f32 %v2900_v20, %v1374_v51  ;;  %v1245_v57 = vadd.f32 %v1178_v53, %v360_v43 }
 0x17f   : > { %1797 = vst.msk [vmem:[%s2695_s22 + $0x6c] sm:$0xf] %vm1769_vm4, %v2132_v44  ;;  %v1477_v62 = vmax.f32 %v1413_v54, 0.0 }
 0x180   : > { %1829 = vst.msk [vmem:[%s2695_s22 + $0xec] sm:$0xf] %vm1769_vm4, %v2164_v45  ;;  %v1343_v60 = vld [vmem:[#allocation2 + $0xe8] sm:$0xff]  ;;  %v1509_v63 = vmax.f32 %v1445_v55, 0.0 }
 0x181   : > { %v1375_v61 = vld [vmem:[#allocation2 + $0x1e8] sm:$0xff]  ;;  %v1414_v0 = vadd.f32 %v2900_v20, %v1343_v60  ;;  %1278 = vst.msk [vmem:[#allocation2 + $0xf8] sm:$0xff] %vm232_vm3, %v1213_v56  ;;  %1310 = vst.msk [vmem:[#allocation2 + $0x1f8] sm:$0xff] %vm232_vm3, %v1245_v57  ;;  %v2133_v2 = vpack.c.bf16 %v1477_v62, %v1477_v62 }
 0x182   : > { %v1446_v1 = vadd.f32 %v2900_v20, %v1375_v61  ;;  %v2165_v3 = vpack.c.bf16 %v1509_v63, %v1509_v63 }
 0x183   : > { %v1478_v4 = vmax.f32 %v1414_v0, 0.0  ;;  %1798 = vst.msk [vmem:[%s2695_s22 + $0x70] sm:$0xf] %vm1769_vm4, %v2133_v2 }
 0x184   : > { %v1510_v5 = vmax.f32 %v1446_v1, 0.0  ;;  %1830 = vst.msk [vmem:[%s2695_s22 + $0xf0] sm:$0xf] %vm1769_vm4, %v2165_v3  ;;  %v1344_v8 = vld [vmem:[#allocation2 + $0xf0] sm:$0xff] }
 0x185   : > { %v2134_v6 = vpack.c.bf16 %v1478_v4, %v1478_v4  ;;  %v1376_v9 = vld [vmem:[#allocation2 + $0x1f0] sm:$0xff]  ;;  %v1415_v10 = vadd.f32 %v2900_v20, %v1344_v8 }
 0x186   : > { %v2166_v7 = vpack.c.bf16 %v1510_v5, %v1510_v5  ;;  %v1447_v34 = vadd.f32 %v2900_v20, %v1376_v9 }
 0x187   : > { %1799 = vst.msk [vmem:[%s2695_s22 + $0x74] sm:$0xf] %vm1769_vm4, %v2134_v6  ;;  %v1479_v13 = vmax.f32 %v1415_v10, 0.0 }
 0x188   : > { %1831 = vst.msk [vmem:[%s2695_s22 + $0xf4] sm:$0xf] %vm1769_vm4, %v2166_v7  ;;  %v1345_v11 = vld [vmem:[#allocation2 + $0xf8] sm:$0xff]  ;;  %v1511_v14 = vmax.f32 %v1447_v34, 0.0 }
 0x189   : > { %v1377_v12 = vld [vmem:[#allocation2 + $0x1f8] sm:$0xff]  ;;  %v1416_v15 = vadd.f32 %v2900_v20, %v1345_v11  ;;  %v2135_v17 = vpack.c.bf16 %v1479_v13, %v1479_v13 }
 0x18a   : > { %v1448_v16 = vadd.f32 %v2900_v20, %v1377_v12  ;;  %v2167_v18 = vpack.c.bf16 %v1511_v14, %v1511_v14 }
 0x18b   : > { %v1480_v19 = vmax.f32 %v1416_v15, 0.0  ;;  %1800 = vst.msk [vmem:[%s2695_s22 + $0x78] sm:$0xf] %vm1769_vm4, %v2135_v17 }
 0x18c   : > { %v1512_v21 = vmax.f32 %v1448_v16, 0.0  ;;  %1832 = vst.msk [vmem:[%s2695_s22 + $0xf8] sm:$0xf] %vm1769_vm4, %v2167_v18 }
 0x18d   : > { %v2136_v22 = vpack.c.bf16 %v1480_v19, %v1480_v19 }
 0x18e   : > { %v2168_v23 = vpack.c.bf16 %v1512_v21, %v1512_v21 }
 0x18f   : > { %1801 = vst.msk [vmem:[%s2695_s22 + $0x7c] sm:$0xf] %vm1769_vm4, %v2136_v22 }
 0x190   : > { %1833 = vst.msk [vmem:[%s2695_s22 + $0xfc] sm:$0xf] %vm1769_vm4, %v2168_v23 }
 0x191 PF: > { %s13_s14 = sadd.s32 1, %s2345_s14   ;;  %s2959_s12 = smov %s2341_s13 }
 0x192   : > { %p10_p5 = scmp.ge.s32.totalorder %s13_s14, 6   ;;  %s2960_s13 = smov %s2962_s15 }
 0x194   :  { %12 = sbr.rel (!%p10_p5) target bundleno = 2 (0x2), region = 73 }

</bundles_post_ra>
